<compile_context>
chip_gen: v7x
topology: tpu7x:2x2x1
jax: 0.10.0
libtpu: 0.0.40
codegen_flags: <defaults>
</compile_context>

<pallas_src>
import functools

import jax
import jax.numpy as jnp
from jax.experimental import pallas as pl
from jax.experimental.pallas import tpu as pltpu


def _round_up(x, m):
    return (x + m - 1) // m * m


def textcnn_kernel(x_ref, w_all_ref, b_all_ref, fc_w_ref, fc_b_ref, out_ref,
                   *, kernel_sizes, Co_pad, pad, L_true, TB):
    """One batch tile (TB examples) per grid step.

    x_ref    : (L_pt, TB, E_pad)   bf16, seq-padded embeddings, batch on sublanes
    w_all_ref: (E_pad, N_all)      bf16, all conv taps, each tap 128-aligned
    b_all_ref: (1, nK*Co_pad)      f32 conv biases, per-group 128-aligned
    fc_w_ref : (nK*Co_pad, C_pad)  f32 fc weight, rows grouped per kernel size
    fc_b_ref : (1, C_pad)          f32
    out_ref  : (TB, C_pad)         lane-dense logits slab
    """
    L_pt = x_ref.shape[0]
    E_pad = x_ref.shape[2]
    C_pad = out_ref.shape[1]

    # TB is a multiple of 16 -> this reshape is a pure layout no-op for bf16.
    x2 = x_ref[...].reshape(L_pt * TB, E_pad)

    logits = jnp.zeros((TB, C_pad), jnp.float32)

    goff = 0
    for i, f in enumerate(kernel_sizes):
        # Per-group MXU matmul: every tap j of this kernel size in one dot.
        #   y[l, b, j*Co_pad + c] = sum_e x[l, b, e] * w_f[j, e, c]
        gw = w_all_ref[:, goff:goff + f * Co_pad]            # lane-aligned slice
        goff += f * Co_pad
        y = jnp.dot(x2, gw, preferred_element_type=jnp.float32)
        y = y.reshape(L_pt, TB, f * Co_pad)

        # Shift-add the taps: leading-axis slices are free, column slices are
        # 128-aligned (unmasked vld), adds are plain VPU.
        L_out = L_true + 2 * pad - f + 1
        acc = y[0:L_out, :, 0:Co_pad]
        for j in range(1, f):
            acc = acc + y[j:j + L_out, :, j * Co_pad:(j + 1) * Co_pad]

        # Global max pool over positions = leading-axis reduction (VPU maxes).
        pooled = jnp.max(acc, axis=0)                        # (TB, Co_pad)
        # Bias + ReLU after the max (bias position-constant, ReLU monotone).
        pooled = jnp.maximum(pooled + b_all_ref[:, i * Co_pad:(i + 1) * Co_pad], 0.0)

        # Accumulate the classifier directly (no feature scratch / concat).
        logits = logits + jnp.dot(pooled, fc_w_ref[i * Co_pad:(i + 1) * Co_pad, :],
                                  preferred_element_type=jnp.float32)

    out_ref[...] = (logits + fc_b_ref[...]).astype(out_ref.dtype)


def pack_params(params, *, kernel_sizes, kernel_num, class_num):
    """One-time packing of weights into lane-aligned, bf16 MXU operands."""
    kernel_sizes = tuple(kernel_sizes)
    Co = kernel_num
    nK = len(kernel_sizes)
    V, E = params["embed"].shape
    E_pad = _round_up(E, 128)        # MXU K / lane alignment (e.g. 300 -> 384)
    Co_pad = _round_up(Co, 128)      # each conv tap gets a 128-aligned block
    C_pad = _round_up(class_num, 128)
    N_all = Co_pad * sum(kernel_sizes)

    embed = jnp.zeros((V, E_pad), jnp.bfloat16)
    embed = embed.at[:, :E].set(params["embed"].astype(jnp.bfloat16))

    w_all = jnp.zeros((E_pad, N_all), jnp.bfloat16)
    off = 0
    for f, w in zip(kernel_sizes, params["conv_w"]):
        for j in range(f):
            w_all = w_all.at[:E, off:off + Co].set(w[j].astype(jnp.bfloat16))
            off += Co_pad

    b_all = jnp.zeros((1, nK * Co_pad), jnp.float32)
    for i, b in enumerate(params["conv_b"]):
        b_all = b_all.at[:, i * Co_pad:i * Co_pad + Co].set(b.astype(jnp.float32))

    fc_w = jnp.zeros((nK * Co_pad, C_pad), jnp.float32)   # tiny; keep f32 rows
    for i in range(nK):
        fc_w = fc_w.at[i * Co_pad:i * Co_pad + Co, :class_num].set(
            params["fc_w"][i * Co:(i + 1) * Co].astype(jnp.float32))
    fc_b = jnp.zeros((1, C_pad), jnp.float32).at[:, :class_num].set(
        params["fc_b"].astype(jnp.float32))

    meta = dict(kernel_sizes=kernel_sizes, Co=Co, Co_pad=Co_pad, C_pad=C_pad,
                E=E, E_pad=E_pad, N_all=N_all, class_num=class_num, nK=nK)
    return {"embed": embed, "w_all": w_all, "b_all": b_all,
            "fc_w": fc_w, "fc_b": fc_b, "meta": meta}


def _vmem_limit_bytes():
    # Size the scoped VMEM limit per chip generation (default ~16/32 MiB is far
    # below physical on v5e/v6e; v7x only has 64 MiB physical).
    try:
        cap = pltpu.get_tpu_info().vmem_capacity_bytes
    except Exception:
        cap = 64 * 1024 * 1024
    return int(min((cap * 7) // 8, 100 * 1024 * 1024))


def textcnn_forward(tokens, packed, *, pad=2, batch_tile=128):
    m = packed["meta"]
    ks = m["kernel_sizes"]
    nK, Co_pad, C_pad, E_pad = m["nK"], m["Co_pad"], m["C_pad"], m["E_pad"]
    B, L = tokens.shape

    # Batch tile: multiple of 16 (bf16 sublane packing). Keep grid >= 2 when
    # possible so dimension_semantics=("parallel",) spreads over v7x's 2 TCs.
    TB = max(16, _round_up(min(batch_tile, _round_up(B, 16)), 16))
    B_pad = _round_up(B, TB)
    L_pt = L + 2 * pad

    # --- glue (plain JAX): bf16 gather, shifted axis to the leading dim, and
    # the Conv2d padding=(2,0) zero rows fused into a single pad. ---
    # TODO(synk): gather embedding rows inside the kernel (scalar-prefetched
    # token ids + DMA from an HBM-resident table) to skip this HBM round-trip.
    emb = jnp.take(packed["embed"], tokens, axis=0)          # (B, L, E_pad) bf16
    x = jnp.transpose(emb, (1, 0, 2))                        # (L, B, E_pad)
    x = jnp.pad(x, ((pad, pad), (0, B_pad - B), (0, 0)))     # (L_pt, B_pad, E_pad)

    kernel = functools.partial(textcnn_kernel, kernel_sizes=ks, Co_pad=Co_pad,
                               pad=pad, L_true=L, TB=TB)

    out = pl.pallas_call(
        kernel,
        out_shape=jax.ShapeDtypeStruct((B_pad, C_pad), jnp.float32),
        grid=(B_pad // TB,),
        in_specs=[
            pl.BlockSpec((L_pt, TB, E_pad), lambda i: (0, i, 0)),   # x (batch tile)
            pl.BlockSpec((E_pad, m["N_all"]), lambda i: (0, 0)),    # packed conv W
            pl.BlockSpec((1, nK * Co_pad), lambda i: (0, 0)),       # conv biases
            pl.BlockSpec((nK * Co_pad, C_pad), lambda i: (0, 0)),   # fc W (padded)
            pl.BlockSpec((1, C_pad), lambda i: (0, 0)),             # fc b (padded)
        ],
        out_specs=pl.BlockSpec((TB, C_pad), lambda i: (i, 0)),
        compiler_params=pltpu.CompilerParams(
            dimension_semantics=("parallel",),
            vmem_limit_bytes=_vmem_limit_bytes()),
    )(x, packed["w_all"], packed["b_all"], packed["fc_w"], packed["fc_b"])
    return out[:B, :m["class_num"]]


def init_params(key, vocab_size, embed_dim, class_num, kernel_num, kernel_sizes):
    nK = len(kernel_sizes)
    keys = jax.random.split(key, 2 * nK + 3)
    params = {
        "embed": 0.1 * jax.random.normal(keys[0], (vocab_size, embed_dim), jnp.float32),
        "conv_w": [],
        "conv_b": [],
    }
    for i, f in enumerate(kernel_sizes):
        params["conv_w"].append(
            0.1 * jax.random.normal(keys[1 + 2 * i], (f, embed_dim, kernel_num), jnp.float32))
        params["conv_b"].append(
            0.1 * jax.random.normal(keys[2 + 2 * i], (1, kernel_num), jnp.float32))
    params["fc_w"] = 0.1 * jax.random.normal(
        keys[2 * nK + 1], (kernel_num * nK, class_num), jnp.float32)
    params["fc_b"] = 0.1 * jax.random.normal(
        keys[2 * nK + 2], (1, class_num), jnp.float32)
    return params


def ref_forward(tokens, params, *, kernel_sizes, kernel_num, pad=2):
    """Pure-JAX f32 reference (same math as the PyTorch forward, eval-mode dropout)."""
    emb = params["embed"][tokens]
    x = jnp.pad(emb, ((0, 0), (pad, pad), (0, 0)))
    Co = kernel_num
    feats = []
    for f, w, b in zip(kernel_sizes, params["conv_w"], params["conv_b"]):
        L_out = x.shape[1] - f + 1
        acc = jnp.zeros((x.shape[0], L_out, Co), jnp.float32) + b
        for j in range(f):
            acc = acc + jnp.einsum("ble,ec->blc", x[:, j:j + L_out, :], w[j])
        acc = jnp.maximum(acc, 0.0)
        feats.append(jnp.max(acc, axis=1))
    feat = jnp.concatenate(feats, axis=-1)
    return feat @ params["fc_w"] + params["fc_b"]


if __name__ == "__main__":
    vocab_size = 100
    embed_dim = 32
    class_num = 4
    kernel_num = 8
    kernel_sizes = (3, 4, 5)
    B, L = 28, 9          # batch pads 28->32 (two TB=16 grid steps)

    key = jax.random.PRNGKey(0)
    k_tok, k_par = jax.random.split(key)
    tokens = jax.random.randint(k_tok, (B, L), 0, vocab_size, dtype=jnp.int32)
    params = init_params(k_par, vocab_size, embed_dim, class_num, kernel_num, kernel_sizes)
    packed = pack_params(params, kernel_sizes=kernel_sizes, kernel_num=kernel_num,
                         class_num=class_num)

    logits = textcnn_forward(tokens, packed, batch_tile=16)
    logits = jax.block_until_ready(logits)

    expected = ref_forward(tokens, params,
                           kernel_sizes=kernel_sizes, kernel_num=kernel_num)
    assert logits.shape == (B, class_num)
    # bf16 MXU operands -> looser tolerance than the f32 reference.
    assert jnp.allclose(logits, expected, atol=2e-2, rtol=2e-2), (logits, expected)

    print("KERNEL_OK")
</pallas_src>

<mosaic_0001>
module attributes {stable_mosaic.version = 11 : i64} {
  func.func @textcnn_kernel(%arg0: i32, %arg1: memref<13x16x128xbf16, #tpu.memory_space<vmem>>, %arg2: memref<128x1536xbf16, #tpu.memory_space<vmem>>, %arg3: memref<1x384xf32, #tpu.memory_space<vmem>>, %arg4: memref<384x128xf32, #tpu.memory_space<vmem>>, %arg5: memref<1x128xf32, #tpu.memory_space<vmem>>, %arg6: memref<16x128xf32, #tpu.memory_space<vmem>>) attributes {dimension_semantics = [#tpu.dimension_semantics<parallel>], iteration_bounds = array<i64: 2>, scalar_prefetch = 0 : i64, scratch_operands = 0 : i64, tpu.core_type = #tpu.core_type<tc>, window_params = [{transform_indices = @transform_0, window_bounds = array<i64: 13, 16, 128>}, {pipeline_mode = #tpu.pipeline_mode<synchronous>, transform_indices = @transform_1, window_bounds = array<i64: 128, 1536>}, {pipeline_mode = #tpu.pipeline_mode<synchronous>, transform_indices = @transform_2, window_bounds = array<i64: 1, 384>}, {pipeline_mode = #tpu.pipeline_mode<synchronous>, transform_indices = @transform_3, window_bounds = array<i64: 384, 128>}, {pipeline_mode = #tpu.pipeline_mode<synchronous>, transform_indices = @transform_4, window_bounds = array<i64: 1, 128>}, {transform_indices = @transform_5, window_bounds = array<i64: 16, 128>}]} {
    %c0 = arith.constant 0 : index
    %c0_0 = arith.constant 0 : index
    %c0_1 = arith.constant 0 : index
    %0 = vector.load %arg1[%c0, %c0_0, %c0_1] : memref<13x16x128xbf16, #tpu.memory_space<vmem>>, vector<13x16x128xbf16>
    %1 = vector.shape_cast %0 : vector<13x16x128xbf16> to vector<208x128xbf16>
    %cst = arith.constant 0.000000e+00 : f32
    %2 = vector.broadcast %cst : f32 to vector<16x128xf32>
    %c0_2 = arith.constant 0 : index
    %c0_3 = arith.constant 0 : index
    %3 = vector.load %arg2[%c0_2, %c0_3] : memref<128x1536xbf16, #tpu.memory_space<vmem>>, vector<128x384xbf16>
    %cst_4 = arith.constant dense<0.000000e+00> : vector<208x384xf32>
    %4 = tpu.matmul %1, %3, %cst_4 {dimension_numbers = #tpu.dot_dimension_numbers<[1], [0], [0], [1], [0, 0, 1, 1], [], []>} : vector<208x128xbf16>, vector<128x384xbf16>, vector<208x384xf32> -> vector<208x384xf32>
    %5 = vector.shape_cast %4 : vector<208x384xf32> to vector<13x16x384xf32>
    %6 = vector.extract_strided_slice %5 {offsets = [0, 0, 0], sizes = [11, 16, 128], strides = [1, 1, 1]} : vector<13x16x384xf32> to vector<11x16x128xf32>
    %7 = vector.extract_strided_slice %5 {offsets = [1, 0, 128], sizes = [11, 16, 128], strides = [1, 1, 1]} : vector<13x16x384xf32> to vector<11x16x128xf32>
    %8 = arith.addf %6, %7 : vector<11x16x128xf32>
    %9 = vector.extract_strided_slice %5 {offsets = [2, 0, 256], sizes = [11, 16, 128], strides = [1, 1, 1]} : vector<13x16x384xf32> to vector<11x16x128xf32>
    %10 = arith.addf %8, %9 : vector<11x16x128xf32>
    %cst_5 = arith.constant dense<0xFF800000> : vector<16x128xf32>
    %11 = vector.multi_reduction <maximumf>, %10, %cst_5 [0] : vector<11x16x128xf32> to vector<16x128xf32>
    %c0_6 = arith.constant 0 : index
    %c0_7 = arith.constant 0 : index
    %12 = vector.load %arg3[%c0_6, %c0_7] : memref<1x384xf32, #tpu.memory_space<vmem>>, vector<1x128xf32>
    %13 = vector.broadcast %12 : vector<1x128xf32> to vector<16x128xf32>
    %14 = arith.addf %11, %13 : vector<16x128xf32>
    %cst_8 = arith.constant 0.000000e+00 : f32
    %15 = vector.broadcast %cst_8 : f32 to vector<16x128xf32>
    %16 = arith.maximumf %14, %15 : vector<16x128xf32>
    %c0_9 = arith.constant 0 : index
    %c0_10 = arith.constant 0 : index
    %17 = vector.load %arg4[%c0_9, %c0_10] : memref<384x128xf32, #tpu.memory_space<vmem>>, vector<128x128xf32>
    %cst_11 = arith.constant dense<0.000000e+00> : vector<16x128xf32>
    %18 = tpu.matmul %16, %17, %cst_11 {dimension_numbers = #tpu.dot_dimension_numbers<[1], [0], [0], [1], [0, 0, 1, 1], [], []>} : vector<16x128xf32>, vector<128x128xf32>, vector<16x128xf32> -> vector<16x128xf32>
    %19 = arith.addf %2, %18 : vector<16x128xf32>
    %c0_12 = arith.constant 0 : index
    %c384 = arith.constant 384 : index
    %20 = vector.load %arg2[%c0_12, %c384] : memref<128x1536xbf16, #tpu.memory_space<vmem>>, vector<128x512xbf16>
    %cst_13 = arith.constant dense<0.000000e+00> : vector<208x512xf32>
    %21 = tpu.matmul %1, %20, %cst_13 {dimension_numbers = #tpu.dot_dimension_numbers<[1], [0], [0], [1], [0, 0, 1, 1], [], []>} : vector<208x128xbf16>, vector<128x512xbf16>, vector<208x512xf32> -> vector<208x512xf32>
    %22 = vector.shape_cast %21 : vector<208x512xf32> to vector<13x16x512xf32>
    %23 = vector.extract_strided_slice %22 {offsets = [0, 0, 0], sizes = [10, 16, 128], strides = [1, 1, 1]} : vector<13x16x512xf32> to vector<10x16x128xf32>
    %24 = vector.extract_strided_slice %22 {offsets = [1, 0, 128], sizes = [10, 16, 128], strides = [1, 1, 1]} : vector<13x16x512xf32> to vector<10x16x128xf32>
    %25 = arith.addf %23, %24 : vector<10x16x128xf32>
    %26 = vector.extract_strided_slice %22 {offsets = [2, 0, 256], sizes = [10, 16, 128], strides = [1, 1, 1]} : vector<13x16x512xf32> to vector<10x16x128xf32>
    %27 = arith.addf %25, %26 : vector<10x16x128xf32>
    %28 = vector.extract_strided_slice %22 {offsets = [3, 0, 384], sizes = [10, 16, 128], strides = [1, 1, 1]} : vector<13x16x512xf32> to vector<10x16x128xf32>
    %29 = arith.addf %27, %28 : vector<10x16x128xf32>
    %cst_14 = arith.constant dense<0xFF800000> : vector<16x128xf32>
    %30 = vector.multi_reduction <maximumf>, %29, %cst_14 [0] : vector<10x16x128xf32> to vector<16x128xf32>
    %c0_15 = arith.constant 0 : index
    %c128 = arith.constant 128 : index
    %31 = vector.load %arg3[%c0_15, %c128] : memref<1x384xf32, #tpu.memory_space<vmem>>, vector<1x128xf32>
    %32 = vector.broadcast %31 : vector<1x128xf32> to vector<16x128xf32>
    %33 = arith.addf %30, %32 : vector<16x128xf32>
    %cst_16 = arith.constant 0.000000e+00 : f32
    %34 = vector.broadcast %cst_16 : f32 to vector<16x128xf32>
    %35 = arith.maximumf %33, %34 : vector<16x128xf32>
    %c128_17 = arith.constant 128 : index
    %c0_18 = arith.constant 0 : index
    %36 = vector.load %arg4[%c128_17, %c0_18] : memref<384x128xf32, #tpu.memory_space<vmem>>, vector<128x128xf32>
    %cst_19 = arith.constant dense<0.000000e+00> : vector<16x128xf32>
    %37 = tpu.matmul %35, %36, %cst_19 {dimension_numbers = #tpu.dot_dimension_numbers<[1], [0], [0], [1], [0, 0, 1, 1], [], []>} : vector<16x128xf32>, vector<128x128xf32>, vector<16x128xf32> -> vector<16x128xf32>
    %38 = arith.addf %19, %37 : vector<16x128xf32>
    %c0_20 = arith.constant 0 : index
    %c896 = arith.constant 896 : index
    %39 = vector.load %arg2[%c0_20, %c896] : memref<128x1536xbf16, #tpu.memory_space<vmem>>, vector<128x640xbf16>
    %cst_21 = arith.constant dense<0.000000e+00> : vector<208x640xf32>
    %40 = tpu.matmul %1, %39, %cst_21 {dimension_numbers = #tpu.dot_dimension_numbers<[1], [0], [0], [1], [0, 0, 1, 1], [], []>} : vector<208x128xbf16>, vector<128x640xbf16>, vector<208x640xf32> -> vector<208x640xf32>
    %41 = vector.shape_cast %40 : vector<208x640xf32> to vector<13x16x640xf32>
    %42 = vector.extract_strided_slice %41 {offsets = [0, 0, 0], sizes = [9, 16, 128], strides = [1, 1, 1]} : vector<13x16x640xf32> to vector<9x16x128xf32>
    %43 = vector.extract_strided_slice %41 {offsets = [1, 0, 128], sizes = [9, 16, 128], strides = [1, 1, 1]} : vector<13x16x640xf32> to vector<9x16x128xf32>
    %44 = arith.addf %42, %43 : vector<9x16x128xf32>
    %45 = vector.extract_strided_slice %41 {offsets = [2, 0, 256], sizes = [9, 16, 128], strides = [1, 1, 1]} : vector<13x16x640xf32> to vector<9x16x128xf32>
    %46 = arith.addf %44, %45 : vector<9x16x128xf32>
    %47 = vector.extract_strided_slice %41 {offsets = [3, 0, 384], sizes = [9, 16, 128], strides = [1, 1, 1]} : vector<13x16x640xf32> to vector<9x16x128xf32>
    %48 = arith.addf %46, %47 : vector<9x16x128xf32>
    %49 = vector.extract_strided_slice %41 {offsets = [4, 0, 512], sizes = [9, 16, 128], strides = [1, 1, 1]} : vector<13x16x640xf32> to vector<9x16x128xf32>
    %50 = arith.addf %48, %49 : vector<9x16x128xf32>
    %cst_22 = arith.constant dense<0xFF800000> : vector<16x128xf32>
    %51 = vector.multi_reduction <maximumf>, %50, %cst_22 [0] : vector<9x16x128xf32> to vector<16x128xf32>
    %c0_23 = arith.constant 0 : index
    %c256 = arith.constant 256 : index
    %52 = vector.load %arg3[%c0_23, %c256] : memref<1x384xf32, #tpu.memory_space<vmem>>, vector<1x128xf32>
    %53 = vector.broadcast %52 : vector<1x128xf32> to vector<16x128xf32>
    %54 = arith.addf %51, %53 : vector<16x128xf32>
    %cst_24 = arith.constant 0.000000e+00 : f32
    %55 = vector.broadcast %cst_24 : f32 to vector<16x128xf32>
    %56 = arith.maximumf %54, %55 : vector<16x128xf32>
    %c256_25 = arith.constant 256 : index
    %c0_26 = arith.constant 0 : index
    %57 = vector.load %arg4[%c256_25, %c0_26] : memref<384x128xf32, #tpu.memory_space<vmem>>, vector<128x128xf32>
    %cst_27 = arith.constant dense<0.000000e+00> : vector<16x128xf32>
    %58 = tpu.matmul %56, %57, %cst_27 {dimension_numbers = #tpu.dot_dimension_numbers<[1], [0], [0], [1], [0, 0, 1, 1], [], []>} : vector<16x128xf32>, vector<128x128xf32>, vector<16x128xf32> -> vector<16x128xf32>
    %59 = arith.addf %38, %58 : vector<16x128xf32>
    %c0_28 = arith.constant 0 : index
    %c0_29 = arith.constant 0 : index
    %60 = vector.load %arg5[%c0_28, %c0_29] : memref<1x128xf32, #tpu.memory_space<vmem>>, vector<1x128xf32>
    %61 = vector.broadcast %60 : vector<1x128xf32> to vector<16x128xf32>
    %62 = arith.addf %59, %61 : vector<16x128xf32>
    %c0_30 = arith.constant 0 : index
    %c0_31 = arith.constant 0 : index
    %63 = vector.load %arg6[%c0_30, %c0_31] : memref<16x128xf32, #tpu.memory_space<vmem>>, vector<16x128xf32>
    tpu.vector_store %arg6[%c0_30, %c0_31], %62 {strides = array<i32>} : memref<16x128xf32, #tpu.memory_space<vmem>>, vector<16x128xf32>,
    return
  }
  func.func @transform_0(%arg0: i32) -> (i32, i32, i32) {
    %c0_i32 = arith.constant 0 : i32
    %c0_i32_0 = arith.constant 0 : i32
    %c0_i32_1 = arith.constant 0 : i32
    return %c0_i32, %arg0, %c0_i32_0 : i32, i32, i32
  }
  func.func @transform_1(%arg0: i32) -> (i32, i32) {
    %c0_i32 = arith.constant 0 : i32
    %c0_i32_0 = arith.constant 0 : i32
    %c0_i32_1 = arith.constant 0 : i32
    return %c0_i32, %c0_i32_0 : i32, i32
  }
  func.func @transform_2(%arg0: i32) -> (i32, i32) {
    %c0_i32 = arith.constant 0 : i32
    %c0_i32_0 = arith.constant 0 : i32
    %c0_i32_1 = arith.constant 0 : i32
    return %c0_i32, %c0_i32_0 : i32, i32
  }
  func.func @transform_3(%arg0: i32) -> (i32, i32) {
    %c0_i32 = arith.constant 0 : i32
    %c0_i32_0 = arith.constant 0 : i32
    %c0_i32_1 = arith.constant 0 : i32
    return %c0_i32, %c0_i32_0 : i32, i32
  }
  func.func @transform_4(%arg0: i32) -> (i32, i32) {
    %c0_i32 = arith.constant 0 : i32
    %c0_i32_0 = arith.constant 0 : i32
    %c0_i32_1 = arith.constant 0 : i32
    return %c0_i32, %c0_i32_0 : i32, i32
  }
  func.func @transform_5(%arg0: i32) -> (i32, i32) {
    %c0_i32 = arith.constant 0 : i32
    %c0_i32_0 = arith.constant 0 : i32
    return %arg0, %c0_i32 : i32, i32
  }
}

</mosaic_0001>

<bundles_post_ra>
// kernel: tpu_custom_call.1
= control target key start
LH: loop header
LB: loop body
LE: loop exit
PB: predicated region body
PF: predicated region fallthrough
CT: control target
= control target key end

     0   :  { %10 = vsyncpa [#allocation3], 0  ;;  %s4367_s0 = inlined_call_operand.hbm [shape: bf16[13,32,128], index: 0, kind: input, shape index: {}]   ;;  %s4368_s1 = inlined_call_operand.hbm [shape: bf16[128,1536], index: 1, kind: input, shape index: {}]   ;;  %s4369_s2 = inlined_call_operand.vmem [shape: f32[1,384], index: 2, kind: input, shape index: {}]   ;;  %s4370_s3 = inlined_call_operand.hbm [shape: f32[384,128], index: 3, kind: input, shape index: {}]   ;;  %s4371_s4 = inlined_call_operand.vmem [shape: f32[1,128], index: 4, kind: input, shape index: {}]   ;;  %s4372_s5 = inlined_call_operand.hbm [shape: f32[32,128], index: 5, kind: output, shape index: {}]  }
   0x1   :  { %12 = vsyncpa [#allocation3 + $0x1], 0 }
   0x2   :  { %13 = vsyncpa [#allocation6], 0 }
   0x3   :  { %14 = vsyncpa [#allocation4], 0 }
   0x4   :  { %16 = vsyncpa [#allocation4 + $0x1], 0  ;;  %s3674_s18 = smov 0   ;;  %s3676_s19 = smov 0  }
   0x5   :  { %s3678_s20 = smov 0   ;;  %s3680_s21 = smov 0  }
   0x6 LB: > { %s3695_s22 = sadd.s32 4294967295, %s3624_s21   ;;  %s2680_s23 = sadd.s32 4294967294, %s3624_s21   ;;  %s3624_s21 = sphi %s3680_s21, %s4396_s21   ;;  %s3620_s20 = sphi %s3678_s20, %s4395_s20   ;;  %s3616_s19 = sphi %s3676_s19, %s4394_s19   ;;  %s3612_s18 = sphi %s3674_s18, %s4393_s18  }
   0x7   : > { %s3699_s24 = sadd.s32 1, %s3624_s21   ;;  %s29_s25 = sadd.s32 1, %s3620_s20 }
   0x8   : > { %s26_s26 = ssub.s32 %s3624_s21, %s3699_s24  ;;  %p36_p0 = scmp.ne.s32.totalorder %s3620_s20, %s3616_s19 }
   0x9   : > { %p27_p1 = scmp.eq.s32.totalorder %s26_s26, 0  ;;  %p37_p2 = scmp.eq.s32.totalorder %s3624_s21, 0 }
   0xa   : > { %p42_p3 = scmp.ne.s32.totalorder %s3616_s19, %s3612_s18  ;;  %p4373_p4 = scmp.eq.s32.totalorder %s3695_s22, 0 }
   0xb   : > { %s3711_s27 = scalar_select %p27_p1, %s3620_s20, %s29_s25  }
   0xc   : > { %p3713_p5 = por %p37_p2, %p36_p0  ;;  %p3719_p6 = por %p4373_p4, %p42_p3 }
   0xd   : > { %4378 = sst [smem:[#allocation15_spill]] %s3711_s27  ;;  %p150_p7 = scmp.eq.s32.totalorder %s3695_s22, 1 }
   0xe   : > { %s4379_s28 = scalar_select %p3713_p5, 1, 0 }
   0xf   : > { %s4380_s29 = scalar_select %p3719_p6, 1, 0 }
  0x10   : > { %p156_p8 = scmp.eq.s32.totalorder %s2680_s23, 1  ;;  %p2681_p9 = scmp.ge.s32.totalorder %s3624_s21, 1 }
  0x11   : > { %p163_p10 = scmp.lt.s32.totalorder %s3624_s21, 3  ;;  %p3726_p11 = por %p150_p7, %p36_p0 }
  0x12   : > { %p3730_p12 = por %p156_p8, %p42_p3  ;;  %s3626_s8 = smov [#allocation5]  }
  0x13   : > { %s4381_s30 = scalar_select %p3726_p11, 1, 0 }
  0x14   : > { %s4382_s6 = scalar_select %p3730_p12, 1, 0 }
  0x15   : > { %p3734_p13 = pnand %p2681_p9, %p163_p10  ;;  %s175_s9 = sshll.u32 %s3626_s8, 4  ;;  %s176_s9 = int_to_ptr.vmem [resolvable:$true] %s175_s9 }
  0x16   : > { %s3627_s11 = smov [#allocation7]   ;;  %s3498_s15 = scalar_lea.hbm %s4368_s1, 12288 }
  0x17   : > { %s4383_s7 = scalar_select %p3734_p13, 1, 0 }
  0x18   : > { %p3271_p1 = pneg %p3734_p13  ;;  %s191_s12 = sshll.u32 %s3627_s11, 4  ;;  %s3746_s12 = int_to_ptr.vmem [resolvable:$true] %s191_s12 }
  0x19   : > { %p3499_p0 = scmp.ne.s32.totalorder %s4368_s1, %s3498_s15  ;;  %p3505_p9 = scmp.lt.u32.totalorder %s3498_s15, %s4368_s1 }
  0x1a   : > { %p3742_p2 = pnand %p3271_p1, %p4373_p4 }
  0x1c   : > { %p3500_p3 = pneg %p3742_p2 }
  0x1e   : > { %p3501_p7 = pnand %p3500_p3, %p3499_p0 }
  0x20   : > { %p3502_p8 = pneg %p3501_p7 }
  0x22   : > { %p3507_p10 = pnand %p3505_p9, %p3502_p8 }
  0x24   : > { %3510 = shalt.err (!%p3507_p10)
}
  0x25   : > { %s3511_s26 = scalar_lea.vmem %s176_s9, 12288  ;;  %p3519_p11 = scmp.lt.s32.totalorder %s176_s9, %s176_s9 }
  0x26   : > { %p3512_p1 = scmp.ne.s32.totalorder %s176_s9, %s3511_s26  ;;  %p3520_p6 = scmp.lt.s32.totalorder %s3511_s26, %s3511_s26 }
  0x28   : > { %p3514_p4 = pnand %p3512_p1, %p3500_p3  ;;  %p3521_p13 = por %p3520_p6, %p3519_p11 }
  0x2a   : > { %p3515_p12 = pneg %p3514_p4 }
  0x2c   : > { %p3522_p5 = pnand %p3521_p13, %p3515_p12 }
  0x2e   : > { %3525 = shalt.err (!%p3522_p5)
}
  0x2f   : > { %s3628_s8 = smov 768   ;;  %s3629_s11 = smov 48  }
  0x30   : > { %3274 = dma.hbm_to_vmem [thread:$0]  (!%p3742_p2), %s4368_s1, 12288, %s176_s9, [#allocation6], %s3628_s8, %s3628_s8, %s3629_s11  }
  0x31   : > { %s3526_s17 = scalar_lea.hbm %s4370_s3, 6144 }
  0x32   : > { %p3527_p4 = scmp.ne.s32.totalorder %s4370_s3, %s3526_s17  ;;  %p3533_p11 = scmp.lt.u32.totalorder %s3526_s17, %s4370_s3 }
  0x34   : > { %p3529_p5 = pnand %p3527_p4, %p3500_p3 }
  0x36   : > { %p3530_p6 = pneg %p3529_p5 }
  0x38   : > { %p3535_p12 = pnand %p3533_p11, %p3530_p6 }
  0x3a   : > { %3538 = shalt.err (!%p3535_p12)
}
  0x3b   : > { %s3539_s9 = scalar_lea.vmem %s3746_s12, 6144  ;;  %p3547_p8 = scmp.lt.s32.totalorder %s3746_s12, %s3746_s12 }
  0x3c   : > { %p3540_p13 = scmp.ne.s32.totalorder %s3746_s12, %s3539_s9  ;;  %p3548_p9 = scmp.lt.s32.totalorder %s3539_s9, %s3539_s9 }
  0x3e   : > { %p3542_p0 = pnand %p3540_p13, %p3500_p3  ;;  %p3549_p10 = por %p3548_p9, %p3547_p8 }
  0x40   : > { %p3543_p7 = pneg %p3542_p0 }
  0x42   : > { %p3550_p1 = pnand %p3549_p10, %p3543_p7 }
  0x44   : > { %3553 = shalt.err (!%p3550_p1)
}
  0x45   : > { %s3630_s27 = smov 128   ;;  %s3631_s8 = smov 8  }
  0x46   : > { %3277 = dma.hbm_to_vmem [thread:$0]  (!%p3742_p2), %s4370_s3, 6144, %s3746_s12, [#allocation6], %s3630_s27, %s3630_s27, %s3631_s8  }
  0x47   : > { %p2684_p4 = scmp.ge.s32.totalorder %s3624_s21, 2 }
  0x49   : > { %204 = sbr.rel (%p2684_p4) target bundleno = 96 (0x60), region = 32 }
  0x50   : > { %s208_s14 = sand.u32 1, %s3620_s20   ;;  %s2811_s10 = sshll.u32 %s3624_s21, 7 }
  0x51   : > { %s3250_s15 = smul.u32 104, %s208_s14  ;;  %s3632_s16 = smov 256  }
  0x52   : > { %p4385_p3 = scmp.ne.s32.totalorder %s4379_s28, 0  ;;  %s218_s25 = scalar_lea.hbm %s4367_s0, %s2811_s10 }
  0x53   : > { %s212_s9 = scalar_lea.vmem [#allocation2], %s3250_s15  ;;  %s3633_s8 = smov 128  }
  0x54   : > { %3257 = sst [smem:[#allocation10]] (%p4385_p3), %s3632_s16  ;;  %s231_s27 = sshll.u32 %s212_s9, 4  ;;  %s232_s27 = int_to_ptr.vmem [resolvable:$true] %s231_s27 }
  0x55   : > { %s3256_s12 = scalar_select %p4385_p3, [#allocation0], [#allocation11] }
  0x56   : > { %3258 = sst [smem:[#allocation10 + $0x1]] (%p4385_p3), %s3633_s8  ;;  %s3634_s11 = smov 2  }
  0x57   : > { %s223_s26 = sld [smem:[%s3256_s12]]   ;;  %s3635_s13 = smov 64  }
  0x58   : > { %3259 = sst [smem:[#allocation10 + $0x2]] (%p4385_p3), %s3634_s11  ;;  %s3636_s16 = smov 4  }
  0x59   : > { %3260 = sst [smem:[#allocation10 + $0x3]] (%p4385_p3), %s3635_s13  ;;  %s209_s15 = scalar_lea.sflag [#allocation3], %s208_s14 }
  0x5a   : > { %3261 = sst [smem:[#allocation10 + $0x4]] (%p4385_p3), %s3635_s13  ;;  %s3637_s17 = smov [#allocation9]  }
  0x5b   : > { %3262 = sst [smem:[#allocation10 + $0x5]] (%p4385_p3), %s3636_s16 }
  0x5d   : > { %s2687_s10 = sshll.u32 %s223_s26, 26 }
  0x5e   : > { %s2688_s12 = sadd.s32 134217728, %s2687_s10 }
  0x5f   : > { %3263 = dma.general (%p4385_p3), %s218_s25, 1664, %s232_s27, %s209_s15, %s3637_s17, [#allocation10], %s2688_s12, 0  }
  0x60 PF: > { %p4386_p2 = scmp.ne.s32.totalorder %s4383_s7, 0 }
  0x61   : > { %s3822_s23 = sand.u32 (!%p4386_p2), 1, %s3616_s19   ;;  %p4387_p5 = scmp.ne.s32.totalorder (!%p4386_p2), %s4380_s29, 0 }
  0x62   : > { %256 = sbr.rel (%p4386_p2) target bundleno = 1176 (0x498), region = 40  ;;  %s259_s8 = scalar_lea.sflag (!%p4386_p2), [#allocation3], %s3822_s23 }
  0x63   : > { %s3251_s9 = smul.u32 (!%p4386_p2), 104, %s3822_s23 }
  0x65   : > { %s3826_s11 = scalar_lea.vmem (!%p4386_p2), [#allocation2], %s3251_s9 }
  0x69   : > { %3599 = dma.done.wait (%p4387_p5), %s259_s8, 1664  }
  0x6a   : > { %3601 = vsyncadd (%p4387_p5), %s259_s8, 4294965632  ;;  %p4388_p6 = scmp.eq.s32.totalorder %s3695_s22, 0 }
  0x6c   : > { %3603 = dma.done.wait (%p4388_p6), [#allocation6], 18432   ;;  %p4389_p11 = pmov %p4388_p6 }
  0x6d   : > { %v3638_v0 = vmov 0.0   ;;  %vm3639_vm0 = vmmov 0   ;;  %v3640_v1 = vmov 0   ;;  %v3336_v2 = vld [vmem:[#allocation5 + $0x8] ss:$48 sps:$4 sm:$0xff]   ;;  %s2692_s27 = sshll.u32 %s3822_s23, 4 }
  0x6e   : > { %3605 = vsyncadd (%p4389_p11), [#allocation6], 4294948864  ;;  %2909 = vmatprep.subr.bf16.mxu1 %v3638_v0  ;;  %2925 = vmatprep.mubr.msk.bf16.mxu1 %vm3639_vm0, %v3638_v0  ;;  %v3337_v3 = vld [vmem:[#allocation5 + $0x4] ss:$48 sps:$4 sm:$0xff]   ;;  %v3339_v4 = vld [vmem:[#allocation5] ss:$48 sps:$4 sm:$0xff]  }
  0x6f   : > { %596 = vmatprep.mubr.bf16.mxu0 %v3640_v1  ;;  %2910 = vmatpush3.bf16.msra.mxu1 %v3336_v2  ;;  %v3340_v5 = vld [vmem:[#allocation5 + $0x68] ss:$48 sps:$4 sm:$0xff]   ;;  %v3341_v6 = vld [vmem:[#allocation5 + $0x64] ss:$48 sps:$4 sm:$0xff]   ;;  %v3343_v7 = vld [vmem:[#allocation5 + $0x60] ss:$48 sps:$4 sm:$0xff]  }
  0x70   : > { %564 = vmatprep.subr.bf16.mxu0 %v3337_v3  ;;  %2911 = vmatprep.subr.bf16.mxu1 %v3638_v0  ;;  %v3344_v8 = vld [vmem:[#allocation5 + $0xc8] ss:$48 sps:$4 sm:$0xff]   ;;  %v3345_v9 = vld [vmem:[#allocation5 + $0xc4] ss:$48 sps:$4 sm:$0xff]   ;;  %v3347_v10 = vld [vmem:[#allocation5 + $0xc0] ss:$48 sps:$4 sm:$0xff]  }
  0x71   : > { %565 = vmatpush1.bf16.msra.mxu0 %v3339_v4  ;;  %v3349_v11 = vld [vmem:[#allocation5 + $0x124] ss:$48 sps:$4 sm:$0xff]   ;;  %v3348_v12 = vld [vmem:[#allocation5 + $0x128] ss:$48 sps:$4 sm:$0xff]   ;;  %v3351_v13 = vld [vmem:[#allocation5 + $0x120] ss:$48 sps:$4 sm:$0xff]  }
  0x72   : > { %566 = vmatprep.subr.bf16.mxu0 %v3341_v6  ;;  %v3353_v14 = vld [vmem:[#allocation5 + $0x184] ss:$48 sps:$4 sm:$0xff]   ;;  %v3352_v15 = vld [vmem:[#allocation5 + $0x188] ss:$48 sps:$4 sm:$0xff]   ;;  %v3355_v16 = vld [vmem:[#allocation5 + $0x180] ss:$48 sps:$4 sm:$0xff]  }
  0x73   : > { %2912 = vmatpush3.bf16.msra.mxu1 %v3340_v5  ;;  %v3357_v17 = vld [vmem:[#allocation5 + $0x1e4] ss:$48 sps:$4 sm:$0xff]   ;;  %v3356_v18 = vld [vmem:[#allocation5 + $0x1e8] ss:$48 sps:$4 sm:$0xff]   ;;  %v3359_v19 = vld [vmem:[#allocation5 + $0x1e0] ss:$48 sps:$4 sm:$0xff]  }
  0x74   : > { %2913 = vmatprep.subr.bf16.mxu1 %v3638_v0  ;;  %v3361_v20 = vld [vmem:[#allocation5 + $0x244] ss:$48 sps:$4 sm:$0xff]   ;;  %v3360_v21 = vld [vmem:[#allocation5 + $0x248] ss:$48 sps:$4 sm:$0xff]   ;;  %v3363_v22 = vld [vmem:[#allocation5 + $0x240] ss:$48 sps:$4 sm:$0xff]  }
  0x75   : > { %567 = vmatpush1.bf16.msra.mxu0 %v3343_v7  ;;  %v3365_v23 = vld [vmem:[#allocation5 + $0x2a4] ss:$48 sps:$4 sm:$0xff]   ;;  %v3364_v24 = vld [vmem:[#allocation5 + $0x2a8] ss:$48 sps:$4 sm:$0xff]   ;;  %v3367_v25 = vld [vmem:[#allocation5 + $0x2a0] ss:$48 sps:$4 sm:$0xff]  }
  0x76   : > { %568 = vmatprep.subr.bf16.mxu0 %v3345_v9  ;;  %v3371_v26 = vld [vmem:[#allocation5 + $0x18] ss:$48 sps:$4 sm:$0xff]   ;;  %v3375_v28 = vld [vmem:[#allocation5 + $0x10] ss:$48 sps:$4 sm:$0xff]   ;;  %v3369_v29 = vld [vmem:[#allocation5 + $0x14] ss:$48 sps:$4 sm:$0xff]  }
  0x77   : > { %2914 = vmatpush3.bf16.msra.mxu1 %v3344_v8  ;;  %v3848_v27 = vld [vmem:[%s3826_s11] sm:$0xff]   ;;  %v3856_v36 = vld [vmem:[%s3826_s11 + $0x8] sm:$0xff]   ;;  %v3864_v45 = vld [vmem:[%s3826_s11 + $0x10] sm:$0xff]   ;;  %s296_s13 = scalar_lea.vmem [#allocation8], %s2692_s27  ;;  %s2812_s15 = sshll.u32 %s3695_s22, 8 }
  0x78   : > { %2915 = vmatprep.subr.bf16.mxu1 %v3638_v0  ;;  %v3378_v30 = vld [vmem:[#allocation5 + $0x78] ss:$48 sps:$4 sm:$0xff]   ;;  %v3373_v31 = vld [vmem:[#allocation5 + $0xc] ss:$48 sps:$4 sm:$0xff]   ;;  %v3383_v32 = vld [vmem:[#allocation5 + $0x70] ss:$48 sps:$4 sm:$0xff]   ;;  %s4323_s8 = scalar_lea.hbm %s4372_s5, %s2812_s15 }
  0x79   : > { %569 = vmatpush1.bf16.msra.mxu0 %v3347_v10  ;;  %v3376_v33 = vld [vmem:[#allocation5 + $0x74] ss:$48 sps:$4 sm:$0xff]   ;;  %v3386_v34 = vld [vmem:[#allocation5 + $0xd8] ss:$48 sps:$4 sm:$0xff]   ;;  %v3381_v35 = vld [vmem:[#allocation5 + $0x6c] ss:$48 sps:$4 sm:$0xff]  }
  0x7a   : > { %570 = vmatprep.subr.bf16.mxu0 %v3349_v11  ;;  %v3390_v37 = vld [vmem:[#allocation5 + $0xd0] ss:$48 sps:$4 sm:$0xff]   ;;  %v3384_v38 = vld [vmem:[#allocation5 + $0xd4] ss:$48 sps:$4 sm:$0xff]   ;;  %v3393_v39 = vld [vmem:[#allocation5 + $0x138] ss:$48 sps:$4 sm:$0xff]  }
  0x7b   : > { %2916 = vmatpush3.bf16.msra.mxu1 %v3348_v12  ;;  %v3388_v40 = vld [vmem:[#allocation5 + $0xcc] ss:$48 sps:$4 sm:$0xff]   ;;  %v3398_v41 = vld [vmem:[#allocation5 + $0x130] ss:$48 sps:$4 sm:$0xff]   ;;  %v3391_v42 = vld [vmem:[#allocation5 + $0x134] ss:$48 sps:$4 sm:$0xff]  }
  0x7c   : > { %2917 = vmatprep.subr.bf16.mxu1 %v3638_v0  ;;  %v3401_v43 = vld [vmem:[#allocation5 + $0x198] ss:$48 sps:$4 sm:$0xff]   ;;  %v3396_v44 = vld [vmem:[#allocation5 + $0x12c] ss:$48 sps:$4 sm:$0xff]   ;;  %v3406_v46 = vld [vmem:[#allocation5 + $0x190] ss:$48 sps:$4 sm:$0xff]  }
  0x7d   : > { %571 = vmatpush1.bf16.msra.mxu0 %v3351_v13  ;;  %v3399_v47 = vld [vmem:[#allocation5 + $0x194] ss:$48 sps:$4 sm:$0xff]   ;;  %v3409_v48 = vld [vmem:[#allocation5 + $0x1f8] ss:$48 sps:$4 sm:$0xff]   ;;  %v3404_v49 = vld [vmem:[#allocation5 + $0x18c] ss:$48 sps:$4 sm:$0xff]  }
  0x7e   : > { %572 = vmatprep.subr.bf16.mxu0 %v3353_v14  ;;  %v3413_v50 = vld [vmem:[#allocation5 + $0x1f0] ss:$48 sps:$4 sm:$0xff]   ;;  %v3407_v51 = vld [vmem:[#allocation5 + $0x1f4] ss:$48 sps:$4 sm:$0xff]   ;;  %v3411_v52 = vld [vmem:[#allocation5 + $0x1ec] ss:$48 sps:$4 sm:$0xff]  }
  0x7f   : > { %2918 = vmatpush3.bf16.msra.mxu1 %v3352_v15  ;;  %v3871_v53 = vld [vmem:[%s3826_s11 + $0x18] sm:$0xff]   ;;  %v3879_v62 = vld [vmem:[%s3826_s11 + $0x20] sm:$0xff]   ;;  %v3888_v63 = vld [vmem:[%s3826_s11 + $0x28] sm:$0xff]   ;;  %s2588_s16 = sshll.u32 %s296_s13, 4  ;;  %p4390_p13 = scmp.ne.s32.totalorder %s4381_s30, 0  ;;  %s4318_s16 = int_to_ptr.vmem [resolvable:$true] %s2588_s16 }
  0x80   : > { %2919 = vmatprep.subr.bf16.mxu1 %v3638_v0  ;;  %v3416_v54 = vld [vmem:[#allocation5 + $0x258] ss:$48 sps:$4 sm:$0xff]   ;;  %v3414_v55 = vld [vmem:[#allocation5 + $0x254] ss:$48 sps:$4 sm:$0xff]   ;;  %v3421_v56 = vld [vmem:[#allocation5 + $0x250] ss:$48 sps:$4 sm:$0xff]  }
  0x81   : > { %573 = vmatpush1.bf16.msra.mxu0 %v3355_v16  ;;  %v3424_v57 = vld [vmem:[#allocation5 + $0x2b8] ss:$48 sps:$4 sm:$0xff]   ;;  %v3419_v58 = vld [vmem:[#allocation5 + $0x24c] ss:$48 sps:$4 sm:$0xff]   ;;  %v3428_v59 = vld [vmem:[#allocation5 + $0x2b0] ss:$48 sps:$4 sm:$0xff]  }
  0x82   : > { %574 = vmatprep.subr.bf16.mxu0 %v3357_v17  ;;  %v3422_v60 = vld [vmem:[#allocation5 + $0x2b4] ss:$48 sps:$4 sm:$0xff]   ;;  %v3426_v61 = vld [vmem:[#allocation5 + $0x2ac] ss:$48 sps:$4 sm:$0xff]   ;;  %v3431_v10 = vld [vmem:[#allocation5 + $0x20] ss:$48 sps:$4 sm:$0xff]  }
  0x83   : > { %2920 = vmatpush3.bf16.msra.mxu1 %v3356_v18  ;;  %v3896_v2 = vld [vmem:[%s3826_s11 + $0x30] sm:$0xff]   ;;  %v3904_v3 = vld [vmem:[%s3826_s11 + $0x38] sm:$0xff]   ;;  %v3912_v4 = vld [vmem:[%s3826_s11 + $0x40] sm:$0xff]   ;;  %s3554_s28 = scalar_lea.vmem %s4318_s16, 256  ;;  %s3641_s22 = smov [#allocation8]  }
  0x84   : > { %2921 = vmatprep.subr.bf16.mxu1 %v3638_v0  ;;  %v3920_v5 = vld [vmem:[%s3826_s11 + $0x48] sm:$0xff]   ;;  %v3928_v6 = vld [vmem:[%s3826_s11 + $0x50] sm:$0xff]   ;;  %v3936_v7 = vld [vmem:[%s3826_s11 + $0x58] sm:$0xff]   ;;  %p3555_p12 = scmp.ne.s32.totalorder %s4318_s16, %s3554_s28  ;;  %s3558_s29 = sshll.u32 %s3641_s22, 4  ;;  %s3559_s29 = int_to_ptr.vmem [resolvable:$false] %s3558_s29 }
  0x85   : > { %575 = vmatpush1.bf16.msra.mxu0 %v3359_v19  ;;  %v3944_v8 = vld [vmem:[%s3826_s11 + $0x60] sm:$0xff]   ;;  %v1526_v17 = vld [vmem:[#allocation7 + $0x80] sm:$0xff]  ;;  %v1527_v18 = vld [vmem:[#allocation7 + $0x88] sm:$0xff]  ;;  %s3560_s7 = scalar_lea.vmem %s3559_s29, 512  ;;  %p3561_p8 = scmp.lt.s32.totalorder %s4318_s16, %s3559_s29 }
  0x86   : > { %576 = vmatprep.subr.bf16.mxu0 %v3361_v20  ;;  %v3429_v9 = vld [vmem:[#allocation5 + $0x1c] ss:$48 sps:$4 sm:$0xff]   ;;  %v3434_v12 = vld [vmem:[#allocation5 + $0x80] ss:$48 sps:$4 sm:$0xff]   ;;  %v3150_v19 = vpack.c.bf16 %v1527_v18, %v1526_v17  ;;  %p3556_p0 = pnand %p3555_p12, %p4390_p13  ;;  %p3562_p9 = scmp.lt.s32.totalorder %s3560_s7, %s3554_s28 }
  0x87   : > { %2922 = vmatpush3.bf16.msra.mxu1 %v3360_v21  ;;  %v3432_v11 = vld [vmem:[#allocation5 + $0x7c] ss:$48 sps:$4 sm:$0xff]   ;;  %v3437_v14 = vld [vmem:[#allocation5 + $0xe0] ss:$48 sps:$4 sm:$0xff]  }
  0x88   : > { %2923 = vmatprep.subr.bf16.mxu1 %v3638_v0  ;;  %v3435_v13 = vld [vmem:[#allocation5 + $0xdc] ss:$48 sps:$4 sm:$0xff]   ;;  %v3440_v16 = vld [vmem:[#allocation5 + $0x140] ss:$48 sps:$4 sm:$0xff]   ;;  %p3557_p7 = pneg %p3556_p0  ;;  %p3563_p10 = por %p3562_p9, %p3561_p8 }
  0x89   : > { %577 = vmatpush1.bf16.msra.mxu0 %v3363_v22  ;;  %v3438_v15 = vld [vmem:[#allocation5 + $0x13c] ss:$48 sps:$4 sm:$0xff]   ;;  %v3443_v21 = vld [vmem:[#allocation5 + $0x1a0] ss:$48 sps:$4 sm:$0xff]  }
  0x8a   : > { %578 = vmatprep.subr.bf16.mxu0 %v3365_v23  ;;  %v3441_v20 = vld [vmem:[#allocation5 + $0x19c] ss:$48 sps:$4 sm:$0xff]   ;;  %v1528_v22 = vld [vmem:[#allocation7 + $0x90] sm:$0xff]  ;;  %p3564_p1 = pnand %p3563_p10, %p3557_p7 }
  0x8b   : > { %2924 = vmatpush3.bf16.msra.mxu1 %v3364_v24  ;;  %v1529_v23 = vld [vmem:[#allocation7 + $0x98] sm:$0xff]  ;;  %v3452_v17 = vld [vmem:[#allocation5 + $0x2c0] ss:$48 sps:$4 sm:$0xff]  }
  0x8c   : > { %1286 = vmatprep.subr.bf16.mxu1 %v3371_v26  ;;  %v3154_v24 = vpack.c.bf16 %v1529_v23, %v1528_v22 }
  0x8d   : > { %579 = vmatpush1.bf16.msra.mxu0 %v3367_v25 }
  0x8e   : > { %2926 = vmatmul.mubr.bf16.vlgmr.msra.gmra.mrb[0].mxu1 %v3848_v27  ;;  %1135 = vmatprep.subr.bf16.mxu0 %v3375_v28 }
  0x8f   : > { %1287 = vmatpush1.bf16.msra.mxu1 %v3369_v29  ;;  %2929 = vmatprep.mubr.msk.bf16.mxu1 %vm3639_vm0, %v3638_v0 }
  0x90   : > { %597 = vmatmul.mubr.bf16.vlgmr.msra.gmra.mrb[0].mxu0 %v3848_v27  ;;  %1288 = vmatprep.subr.bf16.mxu1 %v3378_v30  ;;  %v3444_v30 = vld [vmem:[#allocation5 + $0x1fc] ss:$48 sps:$4 sm:$0xff]  }
  0x91   : > { %604 = vmatprep.mubr.bf16.mxu0 %v3640_v1  ;;  %1136 = vmatpush1.bf16.msra.mxu0 %v3373_v31  ;;  %v3446_v31 = vld [vmem:[#allocation5 + $0x200] ss:$48 sps:$4 sm:$0xff]  }
  0x92   : > { %1137 = vmatprep.subr.bf16.mxu0 %v3383_v32 }
  0x93   : > { %1289 = vmatpush1.bf16.msra.mxu1 %v3376_v33 }
  0x94   : > { %1290 = vmatprep.subr.bf16.mxu1 %v3386_v34 }
  0x95   : > { %1138 = vmatpush1.bf16.msra.mxu0 %v3381_v35 }
  0x96   : > { %2930 = vmatmul.mubr.bf16.gmra.mrb[4].mxu1 %v3856_v36  ;;  %1139 = vmatprep.subr.bf16.mxu0 %v3390_v37 }
  0x97   : > { %2933 = vmatprep.mubr.msk.bf16.mxu1 %vm3639_vm0, %v3638_v0  ;;  %1291 = vmatpush1.bf16.msra.mxu1 %v3384_v38 }
  0x98   : > { %605 = vmatmul.mubr.bf16.gmra.mrb[4].mxu0 %v3856_v36  ;;  %1292 = vmatprep.subr.bf16.mxu1 %v3393_v39  ;;  %v1530_v39 = vld [vmem:[#allocation7 + $0xa0] sm:$0xff] }
  0x99   : > { %614 = vmatprep.mubr.bf16.mxu0 %v3640_v1  ;;  %1140 = vmatpush1.bf16.msra.mxu0 %v3388_v40  ;;  %v1531_v40 = vld [vmem:[#allocation7 + $0xa8] sm:$0xff] }
  0x9a   : > { %1141 = vmatprep.subr.bf16.mxu0 %v3398_v41 }
  0x9b   : > { %1293 = vmatpush1.bf16.msra.mxu1 %v3391_v42 }
  0x9c   : > { %1294 = vmatprep.subr.bf16.mxu1 %v3401_v43  ;;  %v3158_v43 = vpack.c.bf16 %v1531_v40, %v1530_v39 }
  0x9d   : > { %1142 = vmatpush1.bf16.msra.mxu0 %v3396_v44 }
  0x9e   : > { %2934 = vmatmul.mubr.bf16.gmra.mrb[8].mxu1 %v3864_v45  ;;  %1143 = vmatprep.subr.bf16.mxu0 %v3406_v46 }
  0x9f   : > { %2937 = vmatprep.mubr.msk.bf16.mxu1 %vm3639_vm0, %v3638_v0  ;;  %1295 = vmatpush1.bf16.msra.mxu1 %v3399_v47 }
  0xa0   : > { %615 = vmatmul.mubr.bf16.gmra.mrb[8].mxu0 %v3864_v45  ;;  %1296 = vmatprep.subr.bf16.mxu1 %v3409_v48 }
  0xa1   : > { %624 = vmatprep.mubr.bf16.mxu0 %v3640_v1  ;;  %1144 = vmatpush1.bf16.msra.mxu0 %v3404_v49 }
  0xa2   : > { %1145 = vmatprep.subr.bf16.mxu0 %v3413_v50 }
  0xa3   : > { %1297 = vmatpush1.bf16.msra.mxu1 %v3407_v51  ;;  %v3447_v51 = vld [vmem:[#allocation5 + $0x25c] ss:$48 sps:$4 sm:$0xff]  }
  0xa4   : > { %1298 = vmatprep.subr.bf16.mxu1 %v3416_v54 }
  0xa5   : > { %1146 = vmatpush1.bf16.msra.mxu0 %v3411_v52  ;;  %v3449_v52 = vld [vmem:[#allocation5 + $0x260] ss:$48 sps:$4 sm:$0xff]  }
  0xa6   : > { %2938 = vmatmul.mubr.bf16.gmra.mrb[12].mxu1 %v3871_v53  ;;  %1147 = vmatprep.subr.bf16.mxu0 %v3421_v56 }
  0xa7   : > { %2941 = vmatprep.mubr.msk.bf16.mxu1 %vm3639_vm0, %v3638_v0  ;;  %1299 = vmatpush1.bf16.msra.mxu1 %v3414_v55 }
  0xa8   : > { %625 = vmatmul.mubr.bf16.gmra.mrb[12].mxu0 %v3871_v53  ;;  %1300 = vmatprep.subr.bf16.mxu1 %v3424_v57 }
  0xa9   : > { %634 = vmatprep.mubr.bf16.mxu0 %v3640_v1  ;;  %1148 = vmatpush1.bf16.msra.mxu0 %v3419_v58 }
  0xaa   : > { %1149 = vmatprep.subr.bf16.mxu0 %v3428_v59 }
  0xab   : > { %1301 = vmatpush1.bf16.msra.mxu1 %v3422_v60 }
  0xac   : > { %1948 = vmatprep.subr.bf16.mxu1 %v3431_v10 }
  0xad   : > { %1150 = vmatpush1.bf16.msra.mxu0 %v3426_v61 }
  0xae   : > { %2942 = vmatmul.mubr.bf16.gmra.mrb[16].mxu1 %v3879_v62  ;;  %3151 = vmatprep.subr.bf16.mxu0 %v3150_v19 }
  0xaf   : > { %2945 = vmatprep.mubr.msk.bf16.mxu1 %vm3639_vm0, %v3638_v0 }
  0xb0   : > { %635 = vmatmul.mubr.bf16.gmra.mrb[16].mxu0 %v3879_v62 }
  0xb1   : > { %644 = vmatprep.mubr.bf16.mxu0 %v3640_v1 }
  0xb6   : > { %2946 = vmatmul.mubr.bf16.gmra.mrb[20].mxu1 %v3888_v63 }
  0xb7   : > { %2949 = vmatprep.mubr.msk.bf16.mxu1 %vm3639_vm0, %v3638_v0 }
  0xb8   : > { %645 = vmatmul.mubr.bf16.gmra.mrb[20].mxu0 %v3888_v63 }
  0xb9   : > { %654 = vmatprep.mubr.bf16.mxu0 %v3640_v1 }
  0xbe   : > { %2950 = vmatmul.mubr.bf16.gmra.mrb[24].mxu1 %v3896_v2 }
  0xbf   : > { %2953 = vmatprep.mubr.msk.bf16.mxu1 %vm3639_vm0, %v3638_v0 }
  0xc0   : > { %655 = vmatmul.mubr.bf16.gmra.mrb[24].mxu0 %v3896_v2 }
  0xc1   : > { %664 = vmatprep.mubr.bf16.mxu0 %v3640_v1 }
  0xc6   : > { %2954 = vmatmul.mubr.bf16.gmra.mrb[28].mxu1 %v3904_v3 }
  0xc7   : > { %2957 = vmatprep.mubr.msk.bf16.mxu1 %vm3639_vm0, %v3638_v0 }
  0xc8   : > { %665 = vmatmul.mubr.bf16.gmra.mrb[28].mxu0 %v3904_v3 }
  0xc9   : > { %674 = vmatprep.mubr.bf16.mxu0 %v3640_v1 }
  0xce   : > { %2958 = vmatmul.mubr.bf16.gmra.mrb[32].mxu1 %v3912_v4 }
  0xcf   : > { %2961 = vmatprep.mubr.msk.bf16.mxu1 %vm3639_vm0, %v3638_v0 }
  0xd0   : > { %675 = vmatmul.mubr.bf16.gmra.mrb[32].mxu0 %v3912_v4 }
  0xd1   : > { %684 = vmatprep.mubr.bf16.mxu0 %v3640_v1 }
  0xd6   : > { %2962 = vmatmul.mubr.bf16.gmra.mrb[36].mxu1 %v3920_v5 }
  0xd7   : > { %2965 = vmatprep.mubr.msk.bf16.mxu1 %vm3639_vm0, %v3638_v0 }
  0xd8   : > { %685 = vmatmul.mubr.bf16.gmra.mrb[36].mxu0 %v3920_v5 }
  0xd9   : > { %694 = vmatprep.mubr.bf16.mxu0 %v3640_v1 }
  0xde   : > { %2966 = vmatmul.mubr.bf16.gmra.mrb[40].mxu1 %v3928_v6 }
  0xdf   : > { %2969 = vmatprep.mubr.msk.bf16.mxu1 %vm3639_vm0, %v3638_v0 }
  0xe0   : > { %695 = vmatmul.mubr.bf16.gmra.mrb[40].mxu0 %v3928_v6 }
  0xe1   : > { %704 = vmatprep.mubr.bf16.mxu0 %v3640_v1 }
  0xe6   : > { %2970 = vmatmul.mubr.bf16.gmra.mrb[44].mxu1 %v3936_v7 }
  0xe7   : > { %2973 = vmatprep.mubr.msk.bf16.mxu1 %vm3639_vm0, %v3638_v0 }
  0xe8   : > { %705 = vmatmul.mubr.bf16.gmra.mrb[44].mxu0 %v3936_v7 }
  0xe9   : > { %712 = vmatprep.mubr.bf16.mxu0 %v3640_v1 }
  0xee   : > { %2974 = vmatmul.mubr.bf16.gmra.mrb[48].mxu1 %v3944_v8 }
  0xef   : > { %1318 = vmatprep.mubr.bf16.mxu1 %v3640_v1 }
  0xf0   : > { %713 = vmatmul.mubr.bf16.gmra.mrb[48].mxu0 %v3944_v8 }
  0xf1   : > { %1167 = vmatprep.mubr.bf16.mxu0 %v3640_v1 }
  0xf6   : > { %1319 = vmatmul.mubr.bf16.vlgmr.msra.gmra.mrb[52].mxu1 %v3848_v27 }
  0xf7   : > { %1324 = vmatprep.mubr.bf16.mxu1 %v3640_v1  ;;  %1949 = vmatpush1.bf16.msra.mxu1 %v3429_v9 }
  0xf8   : > { %1168 = vmatmul.mubr.bf16.vlgmr.msra.gmra.mrb[52].mxu0 %v3848_v27  ;;  %1950 = vmatprep.subr.bf16.mxu1 %v3434_v12 }
  0xf9   : > { %1175 = vmatprep.mubr.bf16.mxu0 %v3640_v1  ;;  %3153 = vmatpush3.bf16.msra.mxu0 %v3150_v19 }
  0xfa   : > { %3155 = vmatprep.subr.bf16.mxu0 %v3154_v24 }
  0xfb   : > { %1951 = vmatpush1.bf16.msra.mxu1 %v3432_v11 }
  0xfc   : > { %1952 = vmatprep.subr.bf16.mxu1 %v3437_v14  ;;  %v1533_v14 = vld [vmem:[#allocation7 + $0xb8] sm:$0xff] }
  0xfd   : > { %3157 = vmatpush3.bf16.msra.mxu0 %v3154_v24 }
  0xfe   : > { %1325 = vmatmul.mubr.bf16.gmra.mrb[56].mxu1 %v3856_v36  ;;  %3159 = vmatprep.subr.bf16.mxu0 %v3158_v43 }
  0xff   : > { %1330 = vmatprep.mubr.bf16.mxu1 %v3640_v1  ;;  %1953 = vmatpush1.bf16.msra.mxu1 %v3435_v13  ;;  %v1532_v13 = vld [vmem:[#allocation7 + $0xb0] sm:$0xff] }
 0x100   : > { %1176 = vmatmul.mubr.bf16.gmra.mrb[56].mxu0 %v3856_v36  ;;  %1954 = vmatprep.subr.bf16.mxu1 %v3440_v16 }
 0x101   : > { %1185 = vmatprep.mubr.bf16.mxu0 %v3640_v1  ;;  %3161 = vmatpush3.bf16.msra.mxu0 %v3158_v43  ;;  %v1534_v43 = vld [vmem:[#allocation7 + $0xc0] sm:$0xff] }
 0x103   : > { %1955 = vmatpush1.bf16.msra.mxu1 %v3438_v15  ;;  %v3162_v15 = vpack.c.bf16 %v1533_v14, %v1532_v13 }
 0x104   : > { %1956 = vmatprep.subr.bf16.mxu1 %v3443_v21 }
 0x105   : > { %3163 = vmatprep.subr.bf16.mxu0 %v3162_v15 }
 0x106   : > { %1331 = vmatmul.mubr.bf16.gmra.mrb[60].mxu1 %v3864_v45  ;;  %3165 = vmatpush3.bf16.msra.mxu0 %v3162_v15 }
 0x107   : > { %1338 = vmatprep.mubr.bf16.mxu1 %v3640_v1  ;;  %1957 = vmatpush1.bf16.msra.mxu1 %v3441_v20  ;;  %v3450_v20 = vld [vmem:[#allocation5 + $0x2bc] ss:$48 sps:$4 sm:$0xff]  }
 0x108   : > { %1186 = vmatmul.mubr.bf16.gmra.mrb[60].mxu0 %v3864_v45  ;;  %1958 = vmatprep.subr.bf16.mxu1 %v3446_v31 }
 0x109   : > { %1195 = vmatprep.mubr.bf16.mxu0 %v3640_v1 }
 0x10b   : > { %1959 = vmatpush1.bf16.msra.mxu1 %v3444_v30 }
 0x10c   : > { %1960 = vmatprep.subr.bf16.mxu1 %v3449_v52 }
 0x10e   : > { %1339 = vmatmul.mubr.bf16.gmra.mrb[64].mxu1 %v3871_v53 }
 0x10f   : > { %1348 = vmatprep.mubr.bf16.mxu1 %v3640_v1  ;;  %1961 = vmatpush1.bf16.msra.mxu1 %v3447_v51 }
 0x110   : > { %1196 = vmatmul.mubr.bf16.gmra.mrb[64].mxu0 %v3871_v53  ;;  %1962 = vmatprep.subr.bf16.mxu1 %v3452_v17 }
 0x111   : > { %1205 = vmatprep.mubr.bf16.mxu0 %v3640_v1 }
 0x113   : > { %1963 = vmatpush1.bf16.msra.mxu1 %v3450_v20 }
 0x114   : > { %3047 = vmatprep.subr.bf16.mxu1 %v3638_v0 }
 0x116   : > { %1349 = vmatmul.mubr.bf16.gmra.mrb[68].mxu1 %v3879_v62 }
 0x117   : > { %1358 = vmatprep.mubr.bf16.mxu1 %v3640_v1 }
 0x118   : > { %1206 = vmatmul.mubr.bf16.gmra.mrb[68].mxu0 %v3879_v62 }
 0x119   : > { %1215 = vmatprep.mubr.bf16.mxu0 %v3640_v1 }
 0x11e   : > { %1359 = vmatmul.mubr.bf16.gmra.mrb[72].mxu1 %v3888_v63 }
 0x11f   : > { %1368 = vmatprep.mubr.bf16.mxu1 %v3640_v1 }
 0x120   : > { %1216 = vmatmul.mubr.bf16.gmra.mrb[72].mxu0 %v3888_v63 }
 0x121   : > { %1225 = vmatprep.mubr.bf16.mxu0 %v3640_v1 }
 0x126   : > { %1369 = vmatmul.mubr.bf16.gmra.mrb[76].mxu1 %v3896_v2 }
 0x127   : > { %1378 = vmatprep.mubr.bf16.mxu1 %v3640_v1 }
 0x128   : > { %1226 = vmatmul.mubr.bf16.gmra.mrb[76].mxu0 %v3896_v2 }
 0x129   : > { %1235 = vmatprep.mubr.bf16.mxu0 %v3640_v1 }
 0x12e   : > { %1379 = vmatmul.mubr.bf16.gmra.mrb[80].mxu1 %v3904_v3 }
 0x12f   : > { %1388 = vmatprep.mubr.bf16.mxu1 %v3640_v1 }
 0x130   : > { %1236 = vmatmul.mubr.bf16.gmra.mrb[80].mxu0 %v3904_v3 }
 0x131   : > { %1245 = vmatprep.mubr.bf16.mxu0 %v3640_v1 }
 0x136   : > { %1389 = vmatmul.mubr.bf16.gmra.mrb[84].mxu1 %v3912_v4 }
 0x137   : > { %1398 = vmatprep.mubr.bf16.mxu1 %v3640_v1 }
 0x138   : > { %1246 = vmatmul.mubr.bf16.gmra.mrb[84].mxu0 %v3912_v4 }
 0x139   : > { %1255 = vmatprep.mubr.bf16.mxu0 %v3640_v1 }
 0x13e   : > { %1399 = vmatmul.mubr.bf16.gmra.mrb[88].mxu1 %v3920_v5 }
 0x13f   : > { %1408 = vmatprep.mubr.bf16.mxu1 %v3640_v1 }
 0x140   : > { %1256 = vmatmul.mubr.bf16.gmra.mrb[88].mxu0 %v3920_v5 }
 0x141   : > { %1265 = vmatprep.mubr.bf16.mxu0 %v3640_v1 }
 0x146   : > { %1409 = vmatmul.mubr.bf16.gmra.mrb[92].mxu1 %v3928_v6 }
 0x147   : > { %1418 = vmatprep.mubr.bf16.mxu1 %v3640_v1 }
 0x148   : > { %1266 = vmatmul.mubr.bf16.gmra.mrb[92].mxu0 %v3928_v6 }
 0x149   : > { %1273 = vmatprep.mubr.bf16.mxu0 %v3640_v1 }
 0x14e   : > { %1419 = vmatmul.mubr.bf16.gmra.mrb[96].mxu1 %v3936_v7 }
 0x14f   : > { %1428 = vmatprep.mubr.bf16.mxu1 %v3640_v1 }
 0x150   : > { %1274 = vmatmul.mubr.bf16.gmra.mrb[96].mxu0 %v3936_v7 }
 0x151   : > { %1279 = vmatprep.mubr.bf16.mxu0 %v3640_v1 }
 0x156   : > { %1429 = vmatmul.mubr.bf16.gmra.mrb[100].mxu1 %v3944_v8 }
 0x157   : > { %1980 = vmatprep.mubr.bf16.mxu1 %v3640_v1 }
 0x158   : > { %1280 = vmatmul.mubr.bf16.gmra.mrb[100].mxu0 %v3944_v8 }
 0x15e   : > { %1981 = vmatmul.mubr.bf16.vlgmr.msra.gmra.mrb[104].mxu1 %v3848_v27 }
 0x15f   : > { %1988 = vmatprep.mubr.bf16.mxu1 %v3640_v1 }
 0x161   : > { %v753_v25 = vpop.f32.mrb[0].mxu1 }
 0x162   : > { %v2927_v26 = vpop.f32.mrb[1].mxu1 }
 0x163   : > { %v755_v28 = vpop.f32.mrb[2].mxu1  ;;  %v598_v29 = vpop.f32.mrb[0].mxu0 }
 0x164   : > { %v2928_v32 = vpop.f32.mrb[3].mxu1  ;;  %v600_v33 = vpop.f32.mrb[1].mxu0 }
 0x165   : > { %v601_v34 = vpop.f32.mrb[2].mxu0 }
 0x166   : > { %v603_v35 = vpop.f32.mrb[3].mxu0  ;;  %1989 = vmatmul.mubr.bf16.gmra.mrb[108].mxu1 %v3856_v36 }
 0x167   : > { %1998 = vmatprep.mubr.bf16.mxu1 %v3640_v1 }
 0x169   : > { %v759_v37 = vpop.f32.mrb[4].mxu1 }
 0x16a   : > { %v2931_v38 = vpop.f32.mrb[5].mxu1 }
 0x16b   : > { %v606_v41 = vpop.f32.mrb[4].mxu0  ;;  %v761_v42 = vpop.f32.mrb[6].mxu1 }
 0x16c   : > { %v608_v44 = vpop.f32.mrb[5].mxu0  ;;  %v2932_v46 = vpop.f32.mrb[7].mxu1 }
 0x16d   : > { %v852_v47 = vadd.f32 %v608_v44, %v598_v29  ;;  %v610_v48 = vpop.f32.mrb[6].mxu0  ;;  %v1535_v44 = vld [vmem:[#allocation7 + $0xc8] sm:$0xff] }
 0x16e   : > { %v612_v49 = vpop.f32.mrb[7].mxu0  ;;  %v3166_v27 = vpack.c.bf16 %v1535_v44, %v1534_v43  ;;  %1999 = vmatmul.mubr.bf16.gmra.mrb[112].mxu1 %v3864_v45  ;;  %v1538_v43 = vld [vmem:[#allocation7 + $0xe0] sm:$0xff]  ;;  %v1539_v44 = vld [vmem:[#allocation7 + $0xe8] sm:$0xff] }
 0x16f   : > { %v853_v50 = vadd.f32 %v612_v49, %v601_v34  ;;  %2008 = vmatprep.mubr.bf16.mxu1 %v3640_v1 }
 0x170   : > { %3167 = vmatprep.subr.bf16.mxu0 %v3166_v27 }
 0x171   : > { %v765_v54 = vpop.f32.mrb[8].mxu1  ;;  %3169 = vmatpush3.bf16.msra.mxu0 %v3166_v27 }
 0x172   : > { %v4001_v55 = vadd.f32 %v852_v47, %v765_v54  ;;  %v2935_v56 = vpop.f32.mrb[9].mxu1 }
 0x173   : > { %v616_v57 = vpop.f32.mrb[8].mxu0  ;;  %v768_v58 = vpop.f32.mrb[10].mxu1 }
 0x174   : > { %v4003_v59 = vadd.f32 %v853_v50, %v768_v58  ;;  %v618_v60 = vpop.f32.mrb[9].mxu0  ;;  %v2936_v61 = vpop.f32.mrb[11].mxu1 }
 0x175   : > { %v854_v9 = vadd.f32 %v618_v60, %v606_v41  ;;  %v620_v10 = vpop.f32.mrb[10].mxu0  ;;  %v3453_v61 = vld [vmem:[#allocation5 + $0x2c] ss:$48 sps:$4 sm:$0xff]  }
 0x176   : > { %v622_v11 = vpop.f32.mrb[11].mxu0  ;;  %3048 = vmatpush3.bf16.msra.mxu1 %v3453_v61 }
 0x177   : > { %v855_v12 = vadd.f32 %v622_v11, %v610_v48  ;;  %v1536_v11 = vld [vmem:[#allocation7 + $0xd0] sm:$0xff]  ;;  %3049 = vmatprep.subr.bf16.mxu1 %v3638_v0  ;;  %2009 = vmatmul.mubr.bf16.gmra.mrb[116].mxu1 %v3871_v53 }
 0x178   : > { %2018 = vmatprep.mubr.bf16.mxu1 %v3640_v1 }
 0x179   : > { %v773_v16 = vpop.f32.mrb[12].mxu1 }
 0x17a   : > { %v4005_v18 = vadd.f32 %v854_v9, %v773_v16  ;;  %v2939_v19 = vpop.f32.mrb[13].mxu1 }
 0x17b   : > { %v626_v21 = vpop.f32.mrb[12].mxu0  ;;  %v776_v22 = vpop.f32.mrb[14].mxu1 }
 0x17c   : > { %v4007_v23 = vadd.f32 %v855_v12, %v776_v22  ;;  %v628_v24 = vpop.f32.mrb[13].mxu0  ;;  %v2940_v25 = vpop.f32.mrb[15].mxu1  ;;  %v1537_v12 = vld [vmem:[#allocation7 + $0xd8] sm:$0xff] }
 0x17d   : > { %v856_v26 = vadd.f32 %v628_v24, %v616_v57  ;;  %v630_v28 = vpop.f32.mrb[14].mxu0  ;;  %v3170_v13 = vpack.c.bf16 %v1537_v12, %v1536_v11 }
 0x17e   : > { %v632_v29 = vpop.f32.mrb[15].mxu0 }
 0x17f   : > { %v857_v30 = vadd.f32 %v632_v29, %v620_v10  ;;  %3171 = vmatprep.subr.bf16.mxu0 %v3170_v13  ;;  %2019 = vmatmul.mubr.bf16.gmra.mrb[120].mxu1 %v3879_v62 }
 0x180   : > { %3173 = vmatpush3.bf16.msra.mxu0 %v3170_v13  ;;  %2028 = vmatprep.mubr.bf16.mxu1 %v3640_v1 }
 0x181   : > { %v781_v31 = vpop.f32.mrb[16].mxu1 }
 0x182   : > { %v878_v32 = vadd.f32 %v856_v26, %v781_v31  ;;  %v2943_v33 = vpop.f32.mrb[17].mxu1 }
 0x183   : > { %v636_v34 = vpop.f32.mrb[16].mxu0  ;;  %v784_v35 = vpop.f32.mrb[18].mxu1 }
 0x184   : > { %v896_v37 = vmax.f32 %v4001_v55, %v878_v32  ;;  %v879_v38 = vadd.f32 %v857_v30, %v784_v35  ;;  %v638_v39 = vpop.f32.mrb[17].mxu0  ;;  %v2944_v40 = vpop.f32.mrb[19].mxu1 }
 0x185   : > { %v858_v41 = vadd.f32 %v638_v39, %v626_v21  ;;  %v640_v42 = vpop.f32.mrb[18].mxu0 }
 0x186   : > { %v906_v46 = vmax.f32 %v4003_v59, %v879_v38  ;;  %v642_v47 = vpop.f32.mrb[19].mxu0 }
 0x187   : > { %v859_v48 = vadd.f32 %v642_v47, %v630_v28  ;;  %v3454_v28 = vld [vmem:[#allocation5 + $0x8c] ss:$48 sps:$4 sm:$0xff]   ;;  %2029 = vmatmul.mubr.bf16.gmra.mrb[124].mxu1 %v3888_v63 }
 0x188   : > { %3050 = vmatpush3.bf16.msra.mxu1 %v3454_v28  ;;  %2038 = vmatprep.mubr.bf16.mxu1 %v3640_v1 }
 0x189   : > { %v789_v49 = vpop.f32.mrb[20].mxu1  ;;  %3051 = vmatprep.subr.bf16.mxu1 %v3638_v0 }
 0x18a   : > { %v880_v50 = vadd.f32 %v858_v41, %v789_v49  ;;  %v2947_v51 = vpop.f32.mrb[21].mxu1 }
 0x18b   : > { %v646_v52 = vpop.f32.mrb[20].mxu0  ;;  %v792_v54 = vpop.f32.mrb[22].mxu1 }
 0x18c   : > { %v897_v55 = vmax.f32 %v4005_v18, %v880_v50  ;;  %v881_v56 = vadd.f32 %v859_v48, %v792_v54  ;;  %v648_v57 = vpop.f32.mrb[21].mxu0  ;;  %v2948_v58 = vpop.f32.mrb[23].mxu1 }
 0x18d   : > { %v860_v59 = vadd.f32 %v648_v57, %v636_v34  ;;  %v650_v60 = vpop.f32.mrb[22].mxu0 }
 0x18e   : > { %v907_v9 = vmax.f32 %v4007_v23, %v881_v56  ;;  %v652_v36 = vpop.f32.mrb[23].mxu0 }
 0x18f   : > { %v861_v10 = vadd.f32 %v652_v36, %v640_v42  ;;  %2039 = vmatmul.mubr.bf16.gmra.mrb[128].mxu1 %v3896_v2 }
 0x190   : > { %2048 = vmatprep.mubr.bf16.mxu1 %v3640_v1 }
 0x191   : > { %v797_v14 = vpop.f32.mrb[24].mxu1 }
 0x192   : > { %v882_v15 = vadd.f32 %v860_v59, %v797_v14  ;;  %v2951_v16 = vpop.f32.mrb[25].mxu1 }
 0x193   : > { %v656_v17 = vpop.f32.mrb[24].mxu0  ;;  %v800_v18 = vpop.f32.mrb[26].mxu1 }
 0x194   : > { %v4021_v19 = vmax.f32 %v896_v37, %v882_v15  ;;  %v883_v20 = vadd.f32 %v861_v10, %v800_v18  ;;  %v658_v21 = vpop.f32.mrb[25].mxu0  ;;  %v2952_v22 = vpop.f32.mrb[27].mxu1 }
 0x195   : > { %v862_v23 = vadd.f32 %v658_v21, %v646_v52  ;;  %v660_v24 = vpop.f32.mrb[26].mxu0  ;;  %v1541_v21 = vld [vmem:[#allocation7 + $0xf8] sm:$0xff] }
 0x196   : > { %v4023_v45 = vmax.f32 %v906_v46, %v883_v20  ;;  %v662_v25 = vpop.f32.mrb[27].mxu0  ;;  %v3174_v46 = vpack.c.bf16 %v1539_v44, %v1538_v43  ;;  %v1540_v20 = vld [vmem:[#allocation7 + $0xf0] sm:$0xff] }
 0x197   : > { %v863_v26 = vadd.f32 %v662_v25, %v650_v60  ;;  %v3455_v60 = vld [vmem:[#allocation5 + $0xec] ss:$48 sps:$4 sm:$0xff]   ;;  %v3178_v22 = vpack.c.bf16 %v1541_v21, %v1540_v20  ;;  %2049 = vmatmul.mubr.bf16.gmra.mrb[132].mxu1 %v3904_v3 }
 0x198   : > { %3175 = vmatprep.subr.bf16.mxu0 %v3174_v46  ;;  %3052 = vmatpush3.bf16.msra.mxu1 %v3455_v60 }
 0x199   : > { %v805_v29 = vpop.f32.mrb[28].mxu1  ;;  %3177 = vmatpush3.bf16.msra.mxu0 %v3174_v46  ;;  %3053 = vmatprep.subr.bf16.mxu1 %v3638_v0 }
 0x19a   : > { %v884_v30 = vadd.f32 %v862_v23, %v805_v29  ;;  %v2955_v31 = vpop.f32.mrb[29].mxu1  ;;  %3179 = vmatprep.subr.bf16.mxu0 %v3178_v22  ;;  %2058 = vmatprep.mubr.bf16.mxu1 %v3640_v1 }
 0x19b   : > { %v666_v32 = vpop.f32.mrb[28].mxu0  ;;  %v808_v33 = vpop.f32.mrb[30].mxu1 }
 0x19c   : > { %v4028_v34 = vmax.f32 %v897_v55, %v884_v30  ;;  %v885_v35 = vadd.f32 %v863_v26, %v808_v33  ;;  %v668_v37 = vpop.f32.mrb[29].mxu0  ;;  %v2956_v38 = vpop.f32.mrb[31].mxu1  ;;  %v927_v33 = vld [vmem:[#allocation7] sm:$0xff] }
 0x19d   : > { %v864_v39 = vadd.f32 %v668_v37, %v656_v17  ;;  %v670_v40 = vpop.f32.mrb[30].mxu0  ;;  %3181 = vmatpush3.bf16.msra.mxu0 %v3178_v22 }
 0x19e   : > { %v4030_v41 = vmax.f32 %v907_v9, %v885_v35  ;;  %v672_v53 = vpop.f32.mrb[31].mxu0 }
 0x19f   : > { %v865_v42 = vadd.f32 %v672_v53, %v660_v24  ;;  %v3456_v24 = vld [vmem:[#allocation5 + $0x14c] ss:$48 sps:$4 sm:$0xff]   ;;  %2059 = vmatmul.mubr.bf16.gmra.mrb[136].mxu1 %v3912_v4 }
 0x1a0   : > { %3054 = vmatpush3.bf16.msra.mxu1 %v3456_v24  ;;  %2068 = vmatprep.mubr.bf16.mxu1 %v3640_v1 }
 0x1a1   : > { %v813_v47 = vpop.f32.mrb[32].mxu1  ;;  %3055 = vmatprep.subr.bf16.mxu1 %v3638_v0 }
 0x1a2   : > { %v886_v27 = vadd.f32 %v864_v39, %v813_v47  ;;  %v2959_v48 = vpop.f32.mrb[33].mxu1 }
 0x1a3   : > { %v676_v49 = vpop.f32.mrb[32].mxu0  ;;  %v816_v50 = vpop.f32.mrb[34].mxu1 }
 0x1a4   : > { %v900_v51 = vmax.f32 %v4021_v19, %v886_v27  ;;  %v887_v52 = vadd.f32 %v865_v42, %v816_v50  ;;  %v678_v54 = vpop.f32.mrb[33].mxu0  ;;  %v2960_v55 = vpop.f32.mrb[35].mxu1 }
 0x1a5   : > { %v866_v56 = vadd.f32 %v678_v54, %v666_v32  ;;  %v680_v57 = vpop.f32.mrb[34].mxu0 }
 0x1a6   : > { %v910_v58 = vmax.f32 %v4023_v45, %v887_v52  ;;  %v682_v59 = vpop.f32.mrb[35].mxu0 }
 0x1a7   : > { %v867_v62 = vadd.f32 %v682_v59, %v670_v40  ;;  %2069 = vmatmul.mubr.bf16.gmra.mrb[140].mxu1 %v3920_v5 }
 0x1a8   : > { %2076 = vmatprep.mubr.bf16.mxu1 %v3640_v1 }
 0x1a9   : > { %v821_v61 = vpop.f32.mrb[36].mxu1 }
 0x1aa   : > { %v888_v9 = vadd.f32 %v866_v56, %v821_v61  ;;  %v2963_v36 = vpop.f32.mrb[37].mxu1 }
 0x1ab   : > { %v686_v10 = vpop.f32.mrb[36].mxu0  ;;  %v824_v11 = vpop.f32.mrb[38].mxu1 }
 0x1ac   : > { %v901_v12 = vmax.f32 %v4028_v34, %v888_v9  ;;  %v889_v13 = vadd.f32 %v867_v62, %v824_v11  ;;  %v688_v14 = vpop.f32.mrb[37].mxu0  ;;  %v2964_v15 = vpop.f32.mrb[39].mxu1  ;;  %v928_v34 = vld [vmem:[#allocation7 + $0x8] sm:$0xff] }
 0x1ad   : > { %v868_v16 = vadd.f32 %v688_v14, %v676_v49  ;;  %v690_v17 = vpop.f32.mrb[38].mxu0  ;;  %v4044_v37 = vpack.c.bf16 %v928_v34, %v927_v33 }
 0x1ae   : > { %v911_v18 = vmax.f32 %v4030_v41, %v889_v13  ;;  %v692_v63 = vpop.f32.mrb[39].mxu0 }
 0x1af   : > { %v869_v19 = vadd.f32 %v692_v63, %v680_v57  ;;  %3183 = vmatprep.subr.bf16.mxu0 %v4044_v37  ;;  %v3458_v63 = vld [vmem:[#allocation5 + $0x20c] ss:$48 sps:$4 sm:$0xff]   ;;  %2077 = vmatmul.mubr.bf16.gmra.mrb[144].mxu1 %v3928_v6 }
 0x1b0   : > { %2082 = vmatprep.mubr.bf16.mxu1 %v3640_v1 }
 0x1b1   : > { %v829_v23 = vpop.f32.mrb[40].mxu1 }
 0x1b2   : > { %v890_v45 = vadd.f32 %v868_v16, %v829_v23  ;;  %v2967_v25 = vpop.f32.mrb[41].mxu1 }
 0x1b3   : > { %v696_v26 = vpop.f32.mrb[40].mxu0  ;;  %v832_v28 = vpop.f32.mrb[42].mxu1 }
 0x1b4   : > { %v902_v29 = vmax.f32 %v900_v51, %v890_v45  ;;  %v891_v30 = vadd.f32 %v869_v19, %v832_v28  ;;  %v698_v31 = vpop.f32.mrb[41].mxu0  ;;  %v2968_v32 = vpop.f32.mrb[43].mxu1  ;;  %v3457_v51 = vld [vmem:[#allocation5 + $0x1ac] ss:$48 sps:$4 sm:$0xff]  }
 0x1b5   : > { %v870_v2 = vadd.f32 %v698_v31, %v686_v10  ;;  %v700_v35 = vpop.f32.mrb[42].mxu0  ;;  %3056 = vmatpush3.bf16.msra.mxu1 %v3457_v51 }
 0x1b6   : > { %v912_v38 = vmax.f32 %v910_v58, %v891_v30  ;;  %v702_v39 = vpop.f32.mrb[43].mxu0  ;;  %3057 = vmatprep.subr.bf16.mxu1 %v3638_v0  ;;  %v3462_v30 = vld [vmem:[#allocation5 + $0x26c] ss:$48 sps:$4 sm:$0xff]  }
 0x1b7   : > { %v871_v40 = vadd.f32 %v702_v39, %v690_v17  ;;  %2083 = vmatmul.mubr.bf16.gmra.mrb[148].mxu1 %v3936_v7 }
 0x1b8   : > { %2088 = vmatprep.mubr.bf16.mxu1 %v3640_v1 }
 0x1b9   : > { %v837_v41 = vpop.f32.mrb[44].mxu1  ;;  %3058 = vmatpush3.bf16.msra.mxu1 %v3458_v63 }
 0x1ba   : > { %v892_v53 = vadd.f32 %v870_v2, %v837_v41  ;;  %v2971_v42 = vpop.f32.mrb[45].mxu1  ;;  %3059 = vmatprep.subr.bf16.mxu1 %v3638_v0 }
 0x1bb   : > { %v706_v43 = vpop.f32.mrb[44].mxu0  ;;  %v840_v44 = vpop.f32.mrb[46].mxu1 }
 0x1bc   : > { %v903_v46 = vmax.f32 %v901_v12, %v892_v53  ;;  %v893_v47 = vadd.f32 %v871_v40, %v840_v44  ;;  %v707_v27 = vpop.f32.mrb[45].mxu0  ;;  %v2972_v48 = vpop.f32.mrb[47].mxu1 }
 0x1bd   : > { %v872_v49 = vadd.f32 %v707_v27, %v696_v26  ;;  %v709_v50 = vpop.f32.mrb[46].mxu0  ;;  %3060 = vmatpush3.bf16.msra.mxu1 %v3462_v30 }
 0x1be   : > { %v913_v52 = vmax.f32 %v911_v18, %v893_v47  ;;  %v710_v54 = vpop.f32.mrb[47].mxu0  ;;  %3061 = vmatprep.subr.bf16.mxu1 %v3638_v0  ;;  %v3472_v50 = vld [vmem:[#allocation5 + $0x2cc] ss:$48 sps:$4 sm:$0xff]  }
 0x1bf   : > { %v873_v55 = vadd.f32 %v710_v54, %v700_v35  ;;  %2089 = vmatmul.mubr.bf16.gmra.mrb[152].mxu1 %v3944_v8 }
 0x1c0   : > { %3063 = vmatprep.mubr.msk.bf16.mxu1 %vm3639_vm0, %v3638_v0 }
 0x1c1   : > { %v845_v3 = vpop.f32.mrb[48].mxu1  ;;  %3062 = vmatpush3.bf16.msra.mxu1 %v3472_v50 }
 0x1c2   : > { %v894_v56 = vadd.f32 %v872_v49, %v845_v3  ;;  %v2975_v57 = vpop.f32.mrb[49].mxu1 }
 0x1c3   : > { %v848_v58 = vpop.f32.mrb[50].mxu1  ;;  %v714_v59 = vpop.f32.mrb[48].mxu0 }
 0x1c4   : > { %v904_v62 = vmax.f32 %v902_v29, %v894_v56  ;;  %v895_v60 = vadd.f32 %v873_v55, %v848_v58  ;;  %v2976_v61 = vpop.f32.mrb[51].mxu1  ;;  %v715_v9 = vpop.f32.mrb[49].mxu0  ;;  %v4072_v56 = vld [vmem:[%s3826_s11] sm:$0xff]  }
 0x1c5   : > { %v716_v36 = vpop.f32.mrb[50].mxu0 }
 0x1c6   : > { %v4052_v10 = vmax.f32 %v904_v62, %v903_v46  ;;  %v914_v11 = vmax.f32 %v912_v38, %v895_v60  ;;  %v717_v12 = vpop.f32.mrb[51].mxu0 }
 0x1c7   : > { %3064 = vmatmul.mubr.bf16.vlgmr.msra.gmra.mrb[156].mxu1 %v4072_v56 }
 0x1c8   : > { %v4054_v13 = vmax.f32 %v914_v11, %v913_v52  ;;  %3067 = vmatprep.mubr.msk.bf16.mxu1 %vm3639_vm0, %v3638_v0 }
 0x1c9   : > { %v1320_v4 = vpop.f32.mrb[52].mxu1 }
 0x1ca   : > { %v1321_v14 = vpop.f32.mrb[53].mxu1 }
 0x1cb   : > { %v1322_v15 = vpop.f32.mrb[54].mxu1  ;;  %v1169_v16 = vpop.f32.mrb[52].mxu0 }
 0x1cc   : > { %v1323_v17 = vpop.f32.mrb[55].mxu1  ;;  %v1171_v18 = vpop.f32.mrb[53].mxu0 }
 0x1cd   : > { %v1172_v19 = vpop.f32.mrb[54].mxu0  ;;  %v4082_v17 = vld [vmem:[%s3826_s11 + $0x8] sm:$0xff]  }
 0x1ce   : > { %v1174_v20 = vpop.f32.mrb[55].mxu0 }
 0x1cf   : > { %3068 = vmatmul.mubr.bf16.gmra.mrb[160].mxu1 %v4082_v17 }
 0x1d0   : > { %3071 = vmatprep.mubr.msk.bf16.mxu1 %vm3639_vm0, %v3638_v0 }
 0x1d1   : > { %v1326_v21 = vpop.f32.mrb[56].mxu1 }
 0x1d2   : > { %v1327_v5 = vpop.f32.mrb[57].mxu1 }
 0x1d3   : > { %v1177_v22 = vpop.f32.mrb[56].mxu0  ;;  %v1328_v23 = vpop.f32.mrb[58].mxu1 }
 0x1d4   : > { %v1179_v24 = vpop.f32.mrb[57].mxu0  ;;  %v1329_v45 = vpop.f32.mrb[59].mxu1 }
 0x1d5   : > { %v1437_v25 = vadd.f32 %v1179_v24, %v1169_v16  ;;  %v1181_v26 = vpop.f32.mrb[58].mxu0 }
 0x1d6   : > { %v1183_v28 = vpop.f32.mrb[59].mxu0 }
 0x1d7   : > { %v1438_v29 = vadd.f32 %v1183_v28, %v1172_v19 }
 0x1d9   : > { %v1332_v31 = vpop.f32.mrb[60].mxu1 }
 0x1da   : > { %v1457_v32 = vadd.f32 %v1437_v25, %v1332_v31  ;;  %v1334_v6 = vpop.f32.mrb[61].mxu1 }
 0x1db   : > { %v1187_v33 = vpop.f32.mrb[60].mxu0  ;;  %v1335_v34 = vpop.f32.mrb[62].mxu1 }
 0x1dc   : > { %v1458_v2 = vadd.f32 %v1438_v29, %v1335_v34  ;;  %v1189_v35 = vpop.f32.mrb[61].mxu0  ;;  %v1337_v38 = vpop.f32.mrb[63].mxu1 }
 0x1dd   : > { %v1439_v39 = vadd.f32 %v1189_v35, %v1177_v22  ;;  %v1191_v40 = vpop.f32.mrb[62].mxu0 }
 0x1de   : > { %v1193_v41 = vpop.f32.mrb[63].mxu0 }
 0x1df   : > { %v1440_v53 = vadd.f32 %v1193_v41, %v1181_v26 }
 0x1e1   : > { %v1340_v7 = vpop.f32.mrb[64].mxu1 }
 0x1e2   : > { %v1459_v42 = vadd.f32 %v1439_v39, %v1340_v7  ;;  %v1342_v43 = vpop.f32.mrb[65].mxu1 }
 0x1e3   : > { %v4067_v44 = vadd.f32 %v1457_v32, %v1342_v43  ;;  %v1197_v46 = vpop.f32.mrb[64].mxu0  ;;  %v1344_v47 = vpop.f32.mrb[66].mxu1  ;;  %v4090_v32 = vld [vmem:[%s3826_s11 + $0x10] sm:$0xff]  }
 0x1e4   : > { %v1460_v27 = vadd.f32 %v1440_v53, %v1344_v47  ;;  %v1199_v48 = vpop.f32.mrb[65].mxu0  ;;  %v1346_v49 = vpop.f32.mrb[67].mxu1  ;;  %3072 = vmatmul.mubr.bf16.gmra.mrb[164].mxu1 %v4090_v32 }
 0x1e5   : > { %v1441_v51 = vadd.f32 %v1199_v48, %v1187_v33  ;;  %v4069_v52 = vadd.f32 %v1458_v2, %v1346_v49  ;;  %v1201_v54 = vpop.f32.mrb[66].mxu0  ;;  %3075 = vmatprep.mubr.msk.bf16.mxu1 %vm3639_vm0, %v3638_v0 }
 0x1e6   : > { %v1203_v8 = vpop.f32.mrb[67].mxu0 }
 0x1e7   : > { %v1442_v55 = vadd.f32 %v1203_v8, %v1191_v40 }
 0x1e9   : > { %v1350_v3 = vpop.f32.mrb[68].mxu1 }
 0x1ea   : > { %v1461_v57 = vadd.f32 %v1441_v51, %v1350_v3  ;;  %v1352_v58 = vpop.f32.mrb[69].mxu1 }
 0x1eb   : > { %v4077_v59 = vadd.f32 %v1459_v42, %v1352_v58  ;;  %v1207_v62 = vpop.f32.mrb[68].mxu0  ;;  %v1354_v60 = vpop.f32.mrb[70].mxu1 }
 0x1ec   : > { %v1462_v61 = vadd.f32 %v1442_v55, %v1354_v60  ;;  %v1209_v9 = vpop.f32.mrb[69].mxu0  ;;  %v1356_v36 = vpop.f32.mrb[71].mxu1 }
 0x1ed   : > { %v1443_v11 = vadd.f32 %v1209_v9, %v1197_v46  ;;  %v4079_v12 = vadd.f32 %v1460_v27, %v1356_v36  ;;  %v1211_v4 = vpop.f32.mrb[70].mxu0  ;;  %v4098_v27 = vld [vmem:[%s3826_s11 + $0x18] sm:$0xff]   ;;  %v4108_v36 = vld [vmem:[%s3826_s11 + $0x20] sm:$0xff]  }
 0x1ee   : > { %v1213_v14 = vpop.f32.mrb[71].mxu0  ;;  %3076 = vmatmul.mubr.bf16.gmra.mrb[168].mxu1 %v4098_v27 }
 0x1ef   : > { %v1444_v15 = vadd.f32 %v1213_v14, %v1201_v54  ;;  %3079 = vmatprep.mubr.msk.bf16.mxu1 %vm3639_vm0, %v3638_v0 }
 0x1f1   : > { %v1360_v16 = vpop.f32.mrb[72].mxu1 }
 0x1f2   : > { %v1463_v18 = vadd.f32 %v1443_v11, %v1360_v16  ;;  %v1362_v63 = vpop.f32.mrb[73].mxu1 }
 0x1f3   : > { %v1481_v19 = vadd.f32 %v1461_v57, %v1362_v63  ;;  %v1217_v20 = vpop.f32.mrb[72].mxu0  ;;  %v1364_v21 = vpop.f32.mrb[74].mxu1 }
 0x1f4   : > { %v1464_v5 = vadd.f32 %v1444_v15, %v1364_v21  ;;  %v1219_v22 = vpop.f32.mrb[73].mxu0  ;;  %v1366_v23 = vpop.f32.mrb[75].mxu1 }
 0x1f5   : > { %v1497_v24 = vmax.f32 %v4067_v44, %v1481_v19  ;;  %v1445_v45 = vadd.f32 %v1219_v22, %v1207_v62  ;;  %v1482_v25 = vadd.f32 %v1462_v61, %v1366_v23  ;;  %v1221_v26 = vpop.f32.mrb[74].mxu0 }
 0x1f6   : > { %v1223_v28 = vpop.f32.mrb[75].mxu0  ;;  %3080 = vmatmul.mubr.bf16.gmra.mrb[172].mxu1 %v4108_v36 }
 0x1f7   : > { %v1506_v29 = vmax.f32 %v4069_v52, %v1482_v25  ;;  %v1446_v30 = vadd.f32 %v1223_v28, %v1211_v4  ;;  %3083 = vmatprep.mubr.msk.bf16.mxu1 %vm3639_vm0, %v3638_v0  ;;  %v4118_v25 = vld [vmem:[%s3826_s11 + $0x28] sm:$0xff]  }
 0x1f9   : > { %v1370_v31 = vpop.f32.mrb[76].mxu1 }
 0x1fa   : > { %v1465_v6 = vadd.f32 %v1445_v45, %v1370_v31  ;;  %v1372_v33 = vpop.f32.mrb[77].mxu1 }
 0x1fb   : > { %v1483_v34 = vadd.f32 %v1463_v18, %v1372_v33  ;;  %v1227_v2 = vpop.f32.mrb[76].mxu0  ;;  %v1374_v35 = vpop.f32.mrb[78].mxu1 }
 0x1fc   : > { %v1466_v38 = vadd.f32 %v1446_v30, %v1374_v35  ;;  %v1229_v39 = vpop.f32.mrb[77].mxu0  ;;  %v1376_v40 = vpop.f32.mrb[79].mxu1 }
 0x1fd   : > { %v1498_v41 = vmax.f32 %v4077_v59, %v1483_v34  ;;  %v1447_v53 = vadd.f32 %v1229_v39, %v1217_v20  ;;  %v1484_v7 = vadd.f32 %v1464_v5, %v1376_v40  ;;  %v1231_v42 = vpop.f32.mrb[78].mxu0 }
 0x1fe   : > { %v1233_v43 = vpop.f32.mrb[79].mxu0  ;;  %3084 = vmatmul.mubr.bf16.gmra.mrb[176].mxu1 %v4118_v25 }
 0x1ff   : > { %v1507_v44 = vmax.f32 %v4079_v12, %v1484_v7  ;;  %v1448_v46 = vadd.f32 %v1233_v43, %v1221_v26  ;;  %3087 = vmatprep.mubr.msk.bf16.mxu1 %vm3639_vm0, %v3638_v0 }
 0x201   : > { %v1380_v47 = vpop.f32.mrb[80].mxu1 }
 0x202   : > { %v1467_v48 = vadd.f32 %v1447_v53, %v1380_v47  ;;  %v1382_v49 = vpop.f32.mrb[81].mxu1 }
 0x203   : > { %v1485_v50 = vadd.f32 %v1465_v6, %v1382_v49  ;;  %v1237_v51 = vpop.f32.mrb[80].mxu0  ;;  %v1384_v52 = vpop.f32.mrb[82].mxu1 }
 0x204   : > { %v1468_v54 = vadd.f32 %v1448_v46, %v1384_v52  ;;  %v1239_v8 = vpop.f32.mrb[81].mxu0  ;;  %v1386_v55 = vpop.f32.mrb[83].mxu1 }
 0x205   : > { %v4103_v3 = vmax.f32 %v1497_v24, %v1485_v50  ;;  %v1449_v57 = vadd.f32 %v1239_v8, %v1227_v2  ;;  %v1486_v58 = vadd.f32 %v1466_v38, %v1386_v55  ;;  %v1241_v59 = vpop.f32.mrb[82].mxu0 }
 0x206   : > { %v1243_v62 = vpop.f32.mrb[83].mxu0 }
 0x207   : > { %v4105_v60 = vmax.f32 %v1506_v29, %v1486_v58  ;;  %v1450_v61 = vadd.f32 %v1243_v62, %v1231_v42  ;;  %v4126_v42 = vld [vmem:[%s3826_s11 + $0x30] sm:$0xff]   ;;  %v4134_v62 = vld [vmem:[%s3826_s11 + $0x38] sm:$0xff]  }
 0x208   : > { %3088 = vmatmul.mubr.bf16.gmra.mrb[180].mxu1 %v4126_v42 }
 0x209   : > { %v1390_v9 = vpop.f32.mrb[84].mxu1  ;;  %3091 = vmatprep.mubr.msk.bf16.mxu1 %vm3639_vm0, %v3638_v0 }
 0x20a   : > { %v1469_v11 = vadd.f32 %v1449_v57, %v1390_v9  ;;  %v1392_v12 = vpop.f32.mrb[85].mxu1 }
 0x20b   : > { %v1487_v4 = vadd.f32 %v1467_v48, %v1392_v12  ;;  %v1247_v14 = vpop.f32.mrb[84].mxu0  ;;  %v1394_v15 = vpop.f32.mrb[86].mxu1 }
 0x20c   : > { %v1470_v16 = vadd.f32 %v1450_v61, %v1394_v15  ;;  %v1249_v18 = vpop.f32.mrb[85].mxu0  ;;  %v1396_v63 = vpop.f32.mrb[87].mxu1 }
 0x20d   : > { %v4113_v19 = vmax.f32 %v1498_v41, %v1487_v4  ;;  %v1451_v20 = vadd.f32 %v1249_v18, %v1237_v51  ;;  %v1488_v21 = vadd.f32 %v1468_v54, %v1396_v63  ;;  %v1251_v5 = vpop.f32.mrb[86].mxu0 }
 0x20e   : > { %v1253_v22 = vpop.f32.mrb[87].mxu0 }
 0x20f   : > { %v4115_v23 = vmax.f32 %v1507_v44, %v1488_v21  ;;  %v1452_v24 = vadd.f32 %v1253_v22, %v1241_v59 }
 0x210   : > { %3092 = vmatmul.mubr.bf16.gmra.mrb[184].mxu1 %v4134_v62 }
 0x211   : > { %v1400_v45 = vpop.f32.mrb[88].mxu1  ;;  %3095 = vmatprep.mubr.msk.bf16.mxu1 %vm3639_vm0, %v3638_v0 }
 0x212   : > { %v1471_v26 = vadd.f32 %v1451_v20, %v1400_v45  ;;  %v1402_v28 = vpop.f32.mrb[89].mxu1 }
 0x213   : > { %v1489_v29 = vadd.f32 %v1469_v11, %v1402_v28  ;;  %v1257_v30 = vpop.f32.mrb[88].mxu0  ;;  %v1404_v31 = vpop.f32.mrb[90].mxu1 }
 0x214   : > { %v1472_v6 = vadd.f32 %v1452_v24, %v1404_v31  ;;  %v1259_v33 = vpop.f32.mrb[89].mxu0  ;;  %v1406_v34 = vpop.f32.mrb[91].mxu1  ;;  %v2763_v31 = vld [vmem:[%s4369_s2 + $0x1] ss:$0 sm:$0xff] }
 0x215   : > { %v1501_v2 = vmax.f32 %v4103_v3, %v1489_v29  ;;  %v1453_v35 = vadd.f32 %v1259_v33, %v1247_v14  ;;  %v1490_v38 = vadd.f32 %v1470_v16, %v1406_v34  ;;  %v1261_v39 = vpop.f32.mrb[90].mxu0 }
 0x216   : > { %v1263_v40 = vpop.f32.mrb[91].mxu0 }
 0x217   : > { %v1510_v41 = vmax.f32 %v4105_v60, %v1490_v38  ;;  %v1454_v53 = vadd.f32 %v1263_v40, %v1251_v5  ;;  %v4140_v5 = vld [vmem:[%s3826_s11 + $0x40] sm:$0xff]   ;;  %v4152_v40 = vld [vmem:[%s3826_s11 + $0x48] sm:$0xff]  }
 0x218   : > { %3096 = vmatmul.mubr.bf16.gmra.mrb[188].mxu1 %v4140_v5 }
 0x219   : > { %v1410_v7 = vpop.f32.mrb[92].mxu1  ;;  %3099 = vmatprep.mubr.msk.bf16.mxu1 %vm3639_vm0, %v3638_v0 }
 0x21a   : > { %v1473_v43 = vadd.f32 %v1453_v35, %v1410_v7  ;;  %v1412_v44 = vpop.f32.mrb[93].mxu1  ;;  %v930_v7 = vld [vmem:[#allocation7 + $0x18] sm:$0xff] }
 0x21b   : > { %v1491_v46 = vadd.f32 %v1471_v26, %v1412_v44  ;;  %v1267_v47 = vpop.f32.mrb[92].mxu0  ;;  %v1414_v48 = vpop.f32.mrb[94].mxu1 }
 0x21c   : > { %v1474_v49 = vadd.f32 %v1454_v53, %v1414_v48  ;;  %v1268_v50 = vpop.f32.mrb[93].mxu0  ;;  %v1416_v51 = vpop.f32.mrb[95].mxu1  ;;  %v929_v53 = vld [vmem:[#allocation7 + $0x10] sm:$0xff] }
 0x21d   : > { %v1502_v52 = vmax.f32 %v4113_v19, %v1491_v46  ;;  %v1455_v54 = vadd.f32 %v1268_v50, %v1257_v30  ;;  %v1492_v8 = vadd.f32 %v1472_v6, %v1416_v51  ;;  %v1270_v55 = vpop.f32.mrb[94].mxu0  ;;  %v3186_v47 = vpack.c.bf16 %v930_v7, %v929_v53  ;;  %v932_v50 = vld [vmem:[#allocation7 + $0x28] sm:$0xff] }
 0x21e   : > { %v1271_v3 = vpop.f32.mrb[95].mxu0  ;;  %v4160_v51 = vld [vmem:[%s3826_s11 + $0x50] sm:$0xff]  }
 0x21f   : > { %v1511_v57 = vmax.f32 %v4115_v23, %v1492_v8  ;;  %v1456_v58 = vadd.f32 %v1271_v3, %v1261_v39  ;;  %v935_v55 = vld [vmem:[#allocation7 + $0x40] sm:$0xff]  ;;  %v936_v3 = vld [vmem:[#allocation7 + $0x48] sm:$0xff] }
 0x220   : > { %3100 = vmatmul.mubr.bf16.gmra.mrb[192].mxu1 %v4152_v40 }
 0x221   : > { %v1420_v59 = vpop.f32.mrb[96].mxu1  ;;  %3103 = vmatprep.mubr.msk.bf16.mxu1 %vm3639_vm0, %v3638_v0 }
 0x222   : > { %v1475_v60 = vadd.f32 %v1455_v54, %v1420_v59  ;;  %v1422_v61 = vpop.f32.mrb[97].mxu1  ;;  %v934_v54 = vld [vmem:[#allocation7 + $0x38] sm:$0xff] }
 0x223   : > { %v1493_v9 = vadd.f32 %v1473_v43, %v1422_v61  ;;  %v1424_v11 = vpop.f32.mrb[98].mxu1  ;;  %v1275_v14 = vpop.f32.mrb[96].mxu0  ;;  %v938_v59 = vld [vmem:[#allocation7 + $0x58] sm:$0xff]  ;;  %v939_v61 = vld [vmem:[#allocation7 + $0x60] sm:$0xff] }
 0x224   : > { %v1476_v12 = vadd.f32 %v1456_v58, %v1424_v11  ;;  %v1426_v4 = vpop.f32.mrb[99].mxu1  ;;  %v1276_v18 = vpop.f32.mrb[97].mxu0  ;;  %v937_v58 = vld [vmem:[#allocation7 + $0x50] sm:$0xff]  ;;  %v942_v14 = vld [vmem:[#allocation7 + $0x78] sm:$0xff] }
 0x225   : > { %v1503_v15 = vmax.f32 %v1501_v2, %v1493_v9  ;;  %v1494_v16 = vadd.f32 %v1474_v49, %v1426_v4  ;;  %v1277_v63 = vpop.f32.mrb[98].mxu0  ;;  %v2730_v2 = vld [vmem:[%s4369_s2] ss:$0 sm:$0xff]  ;;  %v931_v49 = vld [vmem:[#allocation7 + $0x20] sm:$0xff]  ;;  %v940_v9 = vld [vmem:[#allocation7 + $0x68] sm:$0xff] }
 0x226   : > { %v1278_v20 = vpop.f32.mrb[99].mxu0  ;;  %v3206_v11 = vpack.c.bf16 %v940_v9, %v939_v61  ;;  %v941_v4 = vld [vmem:[#allocation7 + $0x70] sm:$0xff] }
 0x227   : > { %v1512_v19 = vmax.f32 %v1510_v41, %v1494_v16  ;;  %v923_v41 = vadd.f32 %v2730_v2, %v4052_v10  ;;  %v3190_v10 = vpack.c.bf16 %v932_v50, %v931_v49  ;;  %v3461_v16 = vld [vmem:[#allocation5 + $0x28] ss:$48 sps:$4 sm:$0xff]   ;;  %v3479_v49 = vld [vmem:[#allocation5 + $0x264] ss:$48 sps:$4 sm:$0xff]  }
 0x228   : > { %3104 = vmatmul.mubr.bf16.gmra.mrb[196].mxu1 %v4160_v51 }
 0x229   : > { %v1430_v21 = vpop.f32.mrb[100].mxu1  ;;  %v925_v48 = vmax.f32 %v923_v41, 0.0  ;;  %3107 = vmatprep.mubr.msk.bf16.mxu1 %vm3639_vm0, %v3638_v0  ;;  %v3478_v41 = vld [vmem:[#allocation5 + $0x208] ss:$48 sps:$4 sm:$0xff]  }
 0x22a   : > { %v1431_v22 = vpop.f32.mrb[101].mxu1 }
 0x22b   : > { %v1495_v23 = vadd.f32 %v1475_v60, %v1431_v22  ;;  %v1433_v24 = vpop.f32.mrb[102].mxu1  ;;  %v1281_v26 = vpop.f32.mrb[100].mxu0  ;;  %v3202_v60 = vpack.c.bf16 %v938_v59, %v937_v58  ;;  %v3465_v22 = vld [vmem:[#allocation5 + $0x88] ss:$48 sps:$4 sm:$0xff]  }
 0x22c   : > { %v1434_v45 = vpop.f32.mrb[103].mxu1  ;;  %v1282_v30 = vpop.f32.mrb[101].mxu0  ;;  %v3463_v24 = vld [vmem:[#allocation5 + $0x84] ss:$48 sps:$4 sm:$0xff]  }
 0x22d   : > { %v1504_v28 = vmax.f32 %v1502_v52, %v1495_v23  ;;  %v1496_v29 = vadd.f32 %v1476_v12, %v1434_v45  ;;  %v1283_v6 = vpop.f32.mrb[102].mxu0  ;;  %v933_v52 = vld [vmem:[#allocation7 + $0x30] sm:$0xff]  ;;  %v3468_v45 = vld [vmem:[#allocation5 + $0xe8] ss:$48 sps:$4 sm:$0xff]  }
 0x22e   : > { %v1284_v35 = vpop.f32.mrb[103].mxu0  ;;  %v3194_v8 = vpack.c.bf16 %v934_v54, %v933_v52  ;;  %v4172_v12 = vld [vmem:[%s3826_s11 + $0x60] sm:$0xff]  }
 0x22f   : > { %v1505_v33 = vmax.f32 %v1503_v15, %v1504_v28  ;;  %v1513_v34 = vmax.f32 %v1511_v57, %v1496_v29  ;;  %v4166_v57 = vld [vmem:[%s3826_s11 + $0x58] sm:$0xff]   ;;  %v3210_v15 = vpack.c.bf16 %v942_v14, %v941_v4  ;;  %s2575_s11 = scalar_lea.sflag [#allocation4], %s3822_s23 }
 0x230   : > { %3108 = vmatmul.mubr.bf16.gmra.mrb[200].mxu1 %v4166_v57  ;;  %v3466_v28 = vld [vmem:[#allocation5 + $0xe4] ss:$48 sps:$4 sm:$0xff]  }
 0x231   : > { %v1514_v38 = vmax.f32 %v1512_v19, %v1513_v34  ;;  %v1522_v39 = vadd.f32 %v2763_v31, %v1505_v33  ;;  %3111 = vmatprep.mubr.msk.bf16.mxu1 %vm3639_vm0, %v3638_v0  ;;  %v924_v0 = vadd.f32 %v2730_v2, %v4054_v13  ;;  %v1982_v18 = vpop.f32.mrb[104].mxu1  ;;  %v3459_v19 = vld [vmem:[#allocation5 + $0x24] ss:$48 sps:$4 sm:$0xff]   ;;  %v3475_v2 = vld [vmem:[#allocation5 + $0x1a8] ss:$48 sps:$4 sm:$0xff]  }
 0x232   : > { %v1984_v63 = vpop.f32.mrb[105].mxu1  ;;  %v3469_v34 = vld [vmem:[#allocation5 + $0x144] ss:$48 sps:$4 sm:$0xff]  }
 0x233   : > { %v1523_v43 = vadd.f32 %v2763_v31, %v1514_v38  ;;  %v1524_v44 = vmax.f32 %v1522_v39, 0.0  ;;  %v1985_v20 = vpop.f32.mrb[106].mxu1  ;;  %v926_v21 = vmax.f32 %v924_v0, 0.0  ;;  %v3471_v31 = vld [vmem:[#allocation5 + $0x148] ss:$48 sps:$4 sm:$0xff]  }
 0x234   : > { %v1987_v23 = vpop.f32.mrb[107].mxu1  ;;  %v3473_v38 = vld [vmem:[#allocation5 + $0x1a4] ss:$48 sps:$4 sm:$0xff]  }
 0x235   : > { %v1525_v46 = vmax.f32 %v1523_v43, 0.0  ;;  %3009 = vmatprep.mubr.f32.mxu0 %v1524_v44 }
 0x237   : > { %3010 = vmatmul.mubr.f32.vlgmr.msra.gmra.mrb[104].mxu0 %v1525_v46  ;;  %v3476_v46 = vld [vmem:[#allocation5 + $0x204] ss:$48 sps:$4 sm:$0xff]  }
 0x238   : > { %3185 = vmatpush3.bf16.msra.mxu0 %v4044_v37  ;;  %3044 = vmatprep.mubr.f32.mxu0 %v925_v48  ;;  %v3198_v37 = vpack.c.bf16 %v936_v3, %v935_v55  ;;  %v3482_v3 = vld [vmem:[#allocation5 + $0x2c4] ss:$48 sps:$4 sm:$0xff]  }
 0x239   : > { %3187 = vmatprep.subr.bf16.mxu0 %v3186_v47  ;;  %3112 = vmatmul.mubr.bf16.gmra.mrb[204].mxu1 %v4172_v12  ;;  %v1990_v26 = vpop.f32.mrb[108].mxu1 }
 0x23a   : > { %v1992_v13 = vpop.f32.mrb[109].mxu1 }
 0x23b   : > { %v4177_v29 = vadd.f32 %v1992_v13, %v1982_v18  ;;  %v1994_v30 = vpop.f32.mrb[110].mxu1 }
 0x23c   : > { %3189 = vmatpush3.bf16.msra.mxu0 %v3186_v47  ;;  %v1996_v6 = vpop.f32.mrb[111].mxu1  ;;  %v3481_v47 = vld [vmem:[#allocation5 + $0x268] ss:$48 sps:$4 sm:$0xff]  }
 0x23d   : > { %3191 = vmatprep.subr.bf16.mxu0 %v3190_v10  ;;  %v4179_v33 = vadd.f32 %v1996_v6, %v1985_v20 }
 0x240   : > { %3193 = vmatpush3.bf16.msra.mxu0 %v3190_v10  ;;  %v3484_v10 = vld [vmem:[#allocation5 + $0x2c8] ss:$48 sps:$4 sm:$0xff]  }
 0x241   : > { %3195 = vmatprep.subr.bf16.mxu0 %v3194_v8  ;;  %v2000_v35 = vpop.f32.mrb[112].mxu1 }
 0x242   : > { %v2002_v39 = vpop.f32.mrb[113].mxu1 }
 0x243   : > { %v4181_v53 = vadd.f32 %v2002_v39, %v1990_v26  ;;  %v2004_v7 = vpop.f32.mrb[114].mxu1 }
 0x244   : > { %3197 = vmatpush3.bf16.msra.mxu0 %v3194_v8  ;;  %v2006_v43 = vpop.f32.mrb[115].mxu1 }
 0x245   : > { %3199 = vmatprep.subr.bf16.mxu0 %v3198_v37  ;;  %v4183_v44 = vadd.f32 %v2006_v43, %v1994_v30 }
 0x248   : > { %3201 = vmatpush3.bf16.msra.mxu0 %v3198_v37 }
 0x249   : > { %3203 = vmatprep.subr.bf16.mxu0 %v3202_v60 }
 0x24a   : > { %v2010_v48 = vpop.f32.mrb[116].mxu1 }
 0x24b   : > { %v2012_v50 = vpop.f32.mrb[117].mxu1 }
 0x24c   : > { %3205 = vmatpush3.bf16.msra.mxu0 %v3202_v60  ;;  %v4185_v52 = vadd.f32 %v2012_v50, %v2000_v35  ;;  %v2014_v54 = vpop.f32.mrb[118].mxu1 }
 0x24d   : > { %3207 = vmatprep.subr.bf16.mxu0 %v3206_v11  ;;  %v2016_v8 = vpop.f32.mrb[119].mxu1 }
 0x24e   : > { %v4187_v55 = vadd.f32 %v2016_v8, %v2004_v7 }
 0x250   : > { %3209 = vmatpush3.bf16.msra.mxu0 %v3206_v11 }
 0x251   : > { %3211 = vmatprep.subr.bf16.mxu0 %v3210_v15 }
 0x252   : > { %v2020_v37 = vpop.f32.mrb[120].mxu1 }
 0x253   : > { %v2022_v58 = vpop.f32.mrb[121].mxu1 }
 0x254   : > { %3213 = vmatpush3.bf16.msra.mxu0 %v3210_v15  ;;  %v4189_v59 = vadd.f32 %v2022_v58, %v2010_v48  ;;  %v2024_v60 = vpop.f32.mrb[122].mxu1 }
 0x255   : > { %2095 = vmatprep.subr.bf16.mxu0 %v3461_v16  ;;  %v2026_v61 = vpop.f32.mrb[123].mxu1 }
 0x256   : > { %v4192_v9 = vadd.f32 %v2026_v61, %v2014_v54 }
 0x257   : > { %3045 = vmatmul.mubr.f32.vlgmr.msra.gmra.mrb[104].mxu0 %v926_v21 }
 0x258   : > { %2096 = vmatpush1.bf16.msra.mxu0 %v3459_v19  ;;  %2127 = vmatprep.mubr.bf16.mxu0 %v3640_v1 }
 0x259   : > { %2097 = vmatprep.subr.bf16.mxu0 %v3465_v22 }
 0x25a   : > { %v2030_v11 = vpop.f32.mrb[124].mxu1 }
 0x25b   : > { %v2032_v4 = vpop.f32.mrb[125].mxu1 }
 0x25c   : > { %2098 = vmatpush1.bf16.msra.mxu0 %v3463_v24  ;;  %v4195_v14 = vadd.f32 %v2032_v4, %v2020_v37  ;;  %v2034_v15 = vpop.f32.mrb[126].mxu1 }
 0x25d   : > { %2099 = vmatprep.subr.bf16.mxu0 %v3468_v45  ;;  %v2036_v0 = vpop.f32.mrb[127].mxu1 }
 0x25e   : > { %v4198_v16 = vadd.f32 %v2036_v0, %v2024_v60 }
 0x260   : > { %2100 = vmatpush1.bf16.msra.mxu0 %v3466_v28 }
 0x261   : > { %2101 = vmatprep.subr.bf16.mxu0 %v3471_v31 }
 0x262   : > { %v2040_v18 = vpop.f32.mrb[128].mxu1 }
 0x263   : > { %v2042_v63 = vpop.f32.mrb[129].mxu1 }
 0x264   : > { %2102 = vmatpush1.bf16.msra.mxu0 %v3469_v34  ;;  %v4201_v19 = vadd.f32 %v2042_v63, %v2030_v11  ;;  %v2470_v11 = vld [vmem:[#allocation7 + $0x100] sm:$0xff] }
 0x265   : > { %2103 = vmatprep.subr.bf16.mxu0 %v3475_v2 }
 0x268   : > { %2104 = vmatpush1.bf16.msra.mxu0 %v3473_v38 }
 0x269   : > { %2105 = vmatprep.subr.bf16.mxu0 %v3478_v41 }
 0x26c   : > { %2106 = vmatpush1.bf16.msra.mxu0 %v3476_v46 }
 0x26d   : > { %2107 = vmatprep.subr.bf16.mxu0 %v3481_v47 }
 0x270   : > { %2108 = vmatpush1.bf16.msra.mxu0 %v3479_v49 }
 0x271   : > { %2109 = vmatprep.subr.bf16.mxu0 %v3484_v10 }
 0x274   : > { %2110 = vmatpush1.bf16.msra.mxu0 %v3482_v3 }
 0x277   : > { %2128 = vmatmul.mubr.bf16.vlgmr.msra.gmra.mrb[108].mxu0 %v4072_v56  ;;  %v2044_v56 = vpop.f32.mrb[130].mxu1 }
 0x278   : > { %2133 = vmatprep.mubr.bf16.mxu0 %v3640_v1  ;;  %v2046_v20 = vpop.f32.mrb[131].mxu1 }
 0x279   : > { %v4204_v21 = vadd.f32 %v2046_v20, %v2034_v15  ;;  %v2050_v22 = vpop.f32.mrb[132].mxu1  ;;  %v2473_v20 = vld [vmem:[#allocation7 + $0x118] sm:$0xff] }
 0x27a   : > { %v2052_v23 = vpop.f32.mrb[133].mxu1 }
 0x27b   : > { %v4207_v24 = vadd.f32 %v2052_v23, %v2040_v18 }
 0x27f   : > { %2134 = vmatmul.mubr.bf16.gmra.mrb[112].mxu0 %v4082_v17  ;;  %v2054_v17 = vpop.f32.mrb[134].mxu1 }
 0x280   : > { %2139 = vmatprep.mubr.bf16.mxu0 %v3640_v1  ;;  %v2056_v45 = vpop.f32.mrb[135].mxu1 }
 0x281   : > { %v4210_v26 = vadd.f32 %v2056_v45, %v2044_v56  ;;  %v2060_v13 = vpop.f32.mrb[136].mxu1  ;;  %v2472_v56 = vld [vmem:[#allocation7 + $0x110] sm:$0xff] }
 0x282   : > { %v2062_v28 = vpop.f32.mrb[137].mxu1 }
 0x283   : > { %v4213_v30 = vadd.f32 %v2062_v28, %v2050_v22  ;;  %v3218_v22 = vpack.c.bf16 %v2473_v20, %v2472_v56  ;;  %v2482_v56 = vld [vmem:[#allocation7 + $0x160] sm:$0xff]  ;;  %v2483_v20 = vld [vmem:[#allocation7 + $0x168] sm:$0xff] }
 0x287   : > { %2140 = vmatmul.mubr.bf16.gmra.mrb[116].mxu0 %v4090_v32  ;;  %v2064_v32 = vpop.f32.mrb[138].mxu1 }
 0x288   : > { %2147 = vmatprep.mubr.bf16.mxu0 %v3640_v1  ;;  %v2066_v31 = vpop.f32.mrb[139].mxu1 }
 0x289   : > { %v4216_v6 = vadd.f32 %v2066_v31, %v2054_v17  ;;  %v2070_v34 = vpop.f32.mrb[140].mxu1  ;;  %v2475_v31 = vld [vmem:[#allocation7 + $0x128] sm:$0xff] }
 0x28a   : > { %v2071_v2 = vpop.f32.mrb[141].mxu1 }
 0x28b   : > { %v4219_v35 = vadd.f32 %v2071_v2, %v2060_v13 }
 0x28f   : > { %2148 = vmatmul.mubr.bf16.gmra.mrb[120].mxu0 %v4098_v27  ;;  %v2073_v27 = vpop.f32.mrb[142].mxu1 }
 0x290   : > { %2157 = vmatprep.mubr.bf16.mxu0 %v3640_v1  ;;  %v2074_v38 = vpop.f32.mrb[143].mxu1 }
 0x291   : > { %v4222_v39 = vadd.f32 %v2074_v38, %v2064_v32  ;;  %v2078_v41 = vpop.f32.mrb[144].mxu1  ;;  %v2474_v32 = vld [vmem:[#allocation7 + $0x120] sm:$0xff] }
 0x292   : > { %v2079_v7 = vpop.f32.mrb[145].mxu1  ;;  %v2477_v41 = vld [vmem:[#allocation7 + $0x138] sm:$0xff] }
 0x293   : > { %v2080_v43 = vpop.f32.mrb[146].mxu1 }
 0x297   : > { %2158 = vmatmul.mubr.bf16.gmra.mrb[124].mxu0 %v4108_v36  ;;  %v2081_v36 = vpop.f32.mrb[147].mxu1 }
 0x298   : > { %2167 = vmatprep.mubr.bf16.mxu0 %v3640_v1  ;;  %v2084_v46 = vpop.f32.mrb[148].mxu1 }
 0x299   : > { %v2085_v47 = vpop.f32.mrb[149].mxu1 }
 0x29a   : > { %v2086_v48 = vpop.f32.mrb[150].mxu1 }
 0x29b   : > { %v2087_v49 = vpop.f32.mrb[151].mxu1 }
 0x29f   : > { %2168 = vmatmul.mubr.bf16.gmra.mrb[128].mxu0 %v4118_v25  ;;  %v2090_v25 = vpop.f32.mrb[152].mxu1 }
 0x2a0   : > { %2177 = vmatprep.mubr.bf16.mxu0 %v3640_v1  ;;  %v2091_v50 = vpop.f32.mrb[153].mxu1 }
 0x2a1   : > { %v2092_v10 = vpop.f32.mrb[154].mxu1 }
 0x2a2   : > { %v2093_v54 = vpop.f32.mrb[155].mxu1  ;;  %v2478_v10 = vld [vmem:[#allocation7 + $0x140] sm:$0xff] }
 0x2a3   : > { %v2276_v8 = vpop.f32.mrb[156].mxu1  ;;  %v2479_v54 = vld [vmem:[#allocation7 + $0x148] sm:$0xff] }
 0x2a7   : > { %2178 = vmatmul.mubr.bf16.gmra.mrb[132].mxu0 %v4126_v42  ;;  %v3065_v42 = vpop.f32.mrb[157].mxu1 }
 0x2a8   : > { %2187 = vmatprep.mubr.bf16.mxu0 %v3640_v1  ;;  %v2278_v3 = vpop.f32.mrb[158].mxu1  ;;  %v3230_v42 = vpack.c.bf16 %v2479_v54, %v2478_v10 }
 0x2a9   : > { %v3066_v37 = vpop.f32.mrb[159].mxu1 }
 0x2aa   : > { %v2282_v58 = vpop.f32.mrb[160].mxu1 }
 0x2af   : > { %2188 = vmatmul.mubr.bf16.gmra.mrb[136].mxu0 %v4134_v62  ;;  %v3069_v62 = vpop.f32.mrb[161].mxu1 }
 0x2b0   : > { %2197 = vmatprep.mubr.bf16.mxu0 %v3640_v1  ;;  %v2284_v60 = vpop.f32.mrb[162].mxu1 }
 0x2b1   : > { %v3070_v61 = vpop.f32.mrb[163].mxu1 }
 0x2b7   : > { %2198 = vmatmul.mubr.bf16.gmra.mrb[140].mxu0 %v4140_v5  ;;  %v2471_v5 = vld [vmem:[#allocation7 + $0x108] sm:$0xff]  ;;  %v2288_v15 = vpop.f32.mrb[164].mxu1 }
 0x2b8   : > { %2207 = vmatprep.mubr.bf16.mxu0 %v3640_v1  ;;  %v3214_v4 = vpack.c.bf16 %v2471_v5, %v2470_v11  ;;  %v3073_v0 = vpop.f32.mrb[165].mxu1  ;;  %v2480_v5 = vld [vmem:[#allocation7 + $0x150] sm:$0xff] }
 0x2b9   : > { %v2290_v18 = vpop.f32.mrb[166].mxu1 }
 0x2ba   : > { %3215 = vmatprep.subr.bf16.mxu0 %v3214_v4 }
 0x2bb   : > { %3217 = vmatpush3.bf16.msra.mxu0 %v3214_v4  ;;  %v2481_v4 = vld [vmem:[#allocation7 + $0x158] sm:$0xff] }
 0x2bc   : > { %3219 = vmatprep.subr.bf16.mxu0 %v3218_v22  ;;  %v3234_v15 = vpack.c.bf16 %v2481_v4, %v2480_v5 }
 0x2bf   : > { %2208 = vmatmul.mubr.bf16.gmra.mrb[144].mxu0 %v4152_v40  ;;  %v3074_v40 = vpop.f32.mrb[167].mxu1 }
 0x2c0   : > { %2217 = vmatprep.mubr.bf16.mxu0 %v3640_v1  ;;  %3221 = vmatpush3.bf16.msra.mxu0 %v3218_v22  ;;  %v3238_v22 = vpack.c.bf16 %v2483_v20, %v2482_v56 }
 0x2c1   : > { %v2294_v63 = vpop.f32.mrb[168].mxu1 }
 0x2c7   : > { %2218 = vmatmul.mubr.bf16.gmra.mrb[148].mxu0 %v4160_v51  ;;  %v3077_v51 = vpop.f32.mrb[169].mxu1 }
 0x2c8   : > { %2227 = vmatprep.mubr.bf16.mxu0 %v3640_v1  ;;  %v2296_v23 = vpop.f32.mrb[170].mxu1 }
 0x2c9   : > { %v3078_v17 = vpop.f32.mrb[171].mxu1 }
 0x2ca   : > { %v4238_v45 = vpop.f32.mrb[172].mxu1 }
 0x2cb   : > { %v3081_v13 = vpop.f32.mrb[173].mxu1 }
 0x2cc   : > { %v4240_v28 = vpop.f32.mrb[174].mxu1 }
 0x2cf   : > { %2228 = vmatmul.mubr.bf16.gmra.mrb[152].mxu0 %v4166_v57  ;;  %v3082_v57 = vpop.f32.mrb[175].mxu1 }
 0x2d0   : > { %2235 = vmatprep.mubr.bf16.mxu0 %v3640_v1  ;;  %v3222_v1 = vpack.c.bf16 %v2475_v31, %v2474_v32 }
 0x2d1   : > { %v4242_v34 = vpop.f32.mrb[176].mxu1 }
 0x2d2   : > { %3223 = vmatprep.subr.bf16.mxu0 %v3222_v1  ;;  %v3085_v2 = vpop.f32.mrb[177].mxu1 }
 0x2d3   : > { %3225 = vmatpush3.bf16.msra.mxu0 %v3222_v1  ;;  %v4244_v27 = vpop.f32.mrb[178].mxu1  ;;  %v2484_v2 = vld [vmem:[#allocation7 + $0x170] sm:$0xff] }
 0x2d4   : > { %v3086_v38 = vpop.f32.mrb[179].mxu1 }
 0x2d5   : > { %v2485_v38 = vld [vmem:[#allocation7 + $0x178] sm:$0xff] }
 0x2d7   : > { %2236 = vmatmul.mubr.bf16.gmra.mrb[156].mxu0 %v4172_v12  ;;  %v2476_v12 = vld [vmem:[#allocation7 + $0x130] sm:$0xff] }
 0x2d8   : > { %v3226_v7 = vpack.c.bf16 %v2477_v41, %v2476_v12  ;;  %v3242_v12 = vpack.c.bf16 %v2485_v38, %v2484_v2 }
 0x2da   : > { %3227 = vmatprep.subr.bf16.mxu0 %v3226_v7 }
 0x2db   : > { %v4246_v43 = vpop.f32.mrb[180].mxu1  ;;  %3229 = vmatpush3.bf16.msra.mxu0 %v3226_v7 }
 0x2dc   : > { %v3089_v36 = vpop.f32.mrb[181].mxu1  ;;  %3231 = vmatprep.subr.bf16.mxu0 %v3230_v42 }
 0x2dd   : > { %v4248_v46 = vpop.f32.mrb[182].mxu1 }
 0x2de   : > { %v3090_v47 = vpop.f32.mrb[183].mxu1 }
 0x2df   : > { %3233 = vmatpush3.bf16.msra.mxu0 %v3230_v42 }
 0x2e0   : > { %3235 = vmatprep.subr.bf16.mxu0 %v3234_v15 }
 0x2e3   : > { %v4250_v48 = vpop.f32.mrb[184].mxu1  ;;  %3237 = vmatpush3.bf16.msra.mxu0 %v3234_v15 }
 0x2e4   : > { %v3093_v49 = vpop.f32.mrb[185].mxu1  ;;  %3239 = vmatprep.subr.bf16.mxu0 %v3238_v22 }
 0x2e5   : > { %v4252_v25 = vpop.f32.mrb[186].mxu1 }
 0x2e6   : > { %v3094_v50 = vpop.f32.mrb[187].mxu1 }
 0x2e7   : > { %3241 = vmatpush3.bf16.msra.mxu0 %v3238_v22 }
 0x2e8   : > { %3243 = vmatprep.subr.bf16.mxu0 %v3242_v12 }
 0x2eb   : > { %v4254_v8 = vpop.f32.mrb[188].mxu1  ;;  %3245 = vmatpush3.bf16.msra.mxu0 %v3242_v12 }
 0x2ec   : > { %v3097_v3 = vpop.f32.mrb[189].mxu1 }
 0x2ed   : > { %v4256_v37 = vpop.f32.mrb[190].mxu1 }
 0x2ee   : > { %v3098_v58 = vpop.f32.mrb[191].mxu1 }
 0x2f3   : > { %v4258_v62 = vpop.f32.mrb[192].mxu1 }
 0x2f4   : > { %v3101_v60 = vpop.f32.mrb[193].mxu1 }
 0x2f5   : > { %v4260_v61 = vpop.f32.mrb[194].mxu1 }
 0x2f6   : > { %v3102_v11 = vpop.f32.mrb[195].mxu1 }
 0x2fb   : > { %v4262_v0 = vpop.f32.mrb[196].mxu1 }
 0x2fc   : > { %v3105_v18 = vpop.f32.mrb[197].mxu1 }
 0x2fd   : > { %v4264_v40 = vpop.f32.mrb[198].mxu1 }
 0x2fe   : > { %v3106_v63 = vpop.f32.mrb[199].mxu1 }
 0x303   : > { %v4266_v51 = vpop.f32.mrb[200].mxu1 }
 0x304   : > { %v3109_v23 = vpop.f32.mrb[201].mxu1 }
 0x305   : > { %v4268_v17 = vpop.f32.mrb[202].mxu1 }
 0x306   : > { %v3110_v13 = vpop.f32.mrb[203].mxu1 }
 0x30c   : > { %v4270_v57 = vpop.f32.mrb[204].mxu1 }
 0x30d   : > { %v3113_v32 = vpop.f32.mrb[205].mxu1 }
 0x30e   : > { %v4272_v31 = vpop.f32.mrb[206].mxu1 }
 0x30f   : > { %v3114_v1 = vpop.f32.mrb[207].mxu1 }
 0x34a   : > { %v2129_v41 = vpop.f32.mrb[108].mxu0 }
 0x34b   : > { %v2130_v7 = vpop.f32.mrb[109].mxu0 }
 0x34c   : > { %v2131_v36 = vpop.f32.mrb[110].mxu0 }
 0x34d   : > { %v2132_v47 = vpop.f32.mrb[111].mxu0 }
 0x352   : > { %v2135_v49 = vpop.f32.mrb[112].mxu0 }
 0x353   : > { %v2136_v50 = vpop.f32.mrb[113].mxu0 }
 0x354   : > { %v2137_v10 = vpop.f32.mrb[114].mxu0 }
 0x355   : > { %v2138_v54 = vpop.f32.mrb[115].mxu0 }
 0x35a   : > { %v2141_v42 = vpop.f32.mrb[116].mxu0 }
 0x35b   : > { %v2389_v3 = vadd.f32 %v4177_v29, %v2141_v42  ;;  %v2143_v58 = vpop.f32.mrb[117].mxu0 }
 0x35c   : > { %v2144_v60 = vpop.f32.mrb[118].mxu0 }
 0x35d   : > { %v2390_v11 = vadd.f32 %v4179_v33, %v2144_v60  ;;  %v2146_v5 = vpop.f32.mrb[119].mxu0 }
 0x362   : > { %v2149_v4 = vpop.f32.mrb[120].mxu0 }
 0x363   : > { %v2391_v15 = vadd.f32 %v4181_v53, %v2149_v4  ;;  %v2151_v18 = vpop.f32.mrb[121].mxu0 }
 0x364   : > { %v2407_v63 = vadd.f32 %v2389_v3, %v2151_v18  ;;  %v2153_v56 = vpop.f32.mrb[122].mxu0 }
 0x365   : > { %v2392_v20 = vadd.f32 %v4183_v44, %v2153_v56  ;;  %v2155_v22 = vpop.f32.mrb[123].mxu0 }
 0x366   : > { %v2425_v23 = vadd.f32 %v2407_v63, %v4238_v45  ;;  %v2408_v13 = vadd.f32 %v2390_v11, %v2155_v22 }
 0x368   : > { %v2426_v32 = vadd.f32 %v2408_v13, %v4240_v28 }
 0x36a   : > { %v2159_v29 = vpop.f32.mrb[124].mxu0 }
 0x36b   : > { %v2393_v1 = vadd.f32 %v4185_v52, %v2159_v29  ;;  %v2161_v2 = vpop.f32.mrb[125].mxu0 }
 0x36c   : > { %v2409_v33 = vadd.f32 %v2391_v15, %v2161_v2  ;;  %v2163_v38 = vpop.f32.mrb[126].mxu0 }
 0x36d   : > { %v2394_v12 = vadd.f32 %v4187_v55, %v2163_v38  ;;  %v2165_v53 = vpop.f32.mrb[127].mxu0 }
 0x36e   : > { %v2427_v41 = vadd.f32 %v2409_v33, %v4242_v34  ;;  %v2410_v7 = vadd.f32 %v2392_v20, %v2165_v53 }
 0x370   : > { %v2428_v44 = vadd.f32 %v2410_v7, %v4244_v27 }
 0x372   : > { %v2169_v36 = vpop.f32.mrb[128].mxu0 }
 0x373   : > { %v2395_v45 = vadd.f32 %v4189_v59, %v2169_v36  ;;  %v2171_v47 = vpop.f32.mrb[129].mxu0 }
 0x374   : > { %v2411_v49 = vadd.f32 %v2393_v1, %v2171_v47  ;;  %v2173_v28 = vpop.f32.mrb[130].mxu0 }
 0x375   : > { %v2396_v50 = vadd.f32 %v4192_v9, %v2173_v28  ;;  %v2175_v52 = vpop.f32.mrb[131].mxu0 }
 0x376   : > { %v2429_v10 = vadd.f32 %v2411_v49, %v4246_v43  ;;  %v2412_v54 = vadd.f32 %v2394_v12, %v2175_v52 }
 0x378   : > { %v2443_v42 = vmax.f32 %v2425_v23, %v2429_v10  ;;  %v2430_v55 = vadd.f32 %v2412_v54, %v4248_v46 }
 0x37a   : > { %v2451_v3 = vmax.f32 %v2426_v32, %v2430_v55  ;;  %v2179_v34 = vpop.f32.mrb[132].mxu0 }
 0x37b   : > { %v2397_v58 = vadd.f32 %v4195_v14, %v2179_v34  ;;  %v2181_v27 = vpop.f32.mrb[133].mxu0 }
 0x37c   : > { %v2413_v60 = vadd.f32 %v2395_v45, %v2181_v27  ;;  %v2183_v11 = vpop.f32.mrb[134].mxu0 }
 0x37d   : > { %v2398_v59 = vadd.f32 %v4198_v16, %v2183_v11  ;;  %v2185_v5 = vpop.f32.mrb[135].mxu0 }
 0x37e   : > { %v2431_v4 = vadd.f32 %v2413_v60, %v4250_v48  ;;  %v2414_v9 = vadd.f32 %v2396_v50, %v2185_v5 }
 0x380   : > { %v2444_v15 = vmax.f32 %v2427_v41, %v2431_v4  ;;  %v2432_v43 = vadd.f32 %v2414_v9, %v4252_v25 }
 0x382   : > { %v2452_v18 = vmax.f32 %v2428_v44, %v2432_v43  ;;  %v2189_v63 = vpop.f32.mrb[136].mxu0 }
 0x383   : > { %v2399_v46 = vadd.f32 %v4201_v19, %v2189_v63  ;;  %v2191_v56 = vpop.f32.mrb[137].mxu0 }
 0x384   : > { %v2415_v20 = vadd.f32 %v2397_v58, %v2191_v56  ;;  %v2193_v22 = vpop.f32.mrb[138].mxu0 }
 0x385   : > { %v2400_v14 = vadd.f32 %v4204_v21, %v2193_v22  ;;  %v2195_v23 = vpop.f32.mrb[139].mxu0 }
 0x386   : > { %v2433_v13 = vadd.f32 %v2415_v20, %v4254_v8  ;;  %v2416_v16 = vadd.f32 %v2398_v59, %v2195_v23 }
 0x388   : > { %v2445_v32 = vmax.f32 %v2443_v42, %v2433_v13  ;;  %v2434_v48 = vadd.f32 %v2416_v16, %v4256_v37 }
 0x38a   : > { %v2453_v29 = vmax.f32 %v2451_v3, %v2434_v48  ;;  %v2199_v1 = vpop.f32.mrb[140].mxu0 }
 0x38b   : > { %v2401_v25 = vadd.f32 %v4207_v24, %v2199_v1  ;;  %v2201_v2 = vpop.f32.mrb[141].mxu0 }
 0x38c   : > { %v2417_v33 = vadd.f32 %v2399_v46, %v2201_v2  ;;  %v2203_v38 = vpop.f32.mrb[142].mxu0 }
 0x38d   : > { %v2402_v19 = vadd.f32 %v4210_v26, %v2203_v38  ;;  %v2205_v12 = vpop.f32.mrb[143].mxu0 }
 0x38e   : > { %v2435_v53 = vadd.f32 %v2417_v33, %v4258_v62  ;;  %v2418_v21 = vadd.f32 %v2400_v14, %v2205_v12 }
 0x390   : > { %v2446_v41 = vmax.f32 %v2444_v15, %v2435_v53  ;;  %v2436_v8 = vadd.f32 %v2418_v21, %v4260_v61 }
 0x392   : > { %v2454_v7 = vmax.f32 %v2452_v18, %v2436_v8  ;;  %v2209_v44 = vpop.f32.mrb[144].mxu0 }
 0x393   : > { %v2403_v37 = vadd.f32 %v4213_v30, %v2209_v44  ;;  %v2211_v36 = vpop.f32.mrb[145].mxu0 }
 0x394   : > { %v2419_v45 = vadd.f32 %v2401_v25, %v2211_v36  ;;  %v2213_v47 = vpop.f32.mrb[146].mxu0 }
 0x395   : > { %v2404_v24 = vadd.f32 %v4216_v6, %v2213_v47  ;;  %v2215_v49 = vpop.f32.mrb[147].mxu0 }
 0x396   : > { %v2437_v28 = vadd.f32 %v2419_v45, %v4262_v0  ;;  %v2420_v26 = vadd.f32 %v2402_v19, %v2215_v49 }
 0x398   : > { %v2447_v50 = vmax.f32 %v2445_v32, %v2437_v28  ;;  %v2438_v62 = vadd.f32 %v2420_v26, %v4264_v40 }
 0x39a   : > { %v2455_v52 = vmax.f32 %v2453_v29, %v2438_v62  ;;  %v2219_v10 = vpop.f32.mrb[148].mxu0 }
 0x39b   : > { %v2405_v61 = vadd.f32 %v4219_v35, %v2219_v10  ;;  %v2221_v54 = vpop.f32.mrb[149].mxu0 }
 0x39c   : > { %v2421_v42 = vadd.f32 %v2403_v37, %v2221_v54  ;;  %v2223_v55 = vpop.f32.mrb[150].mxu0 }
 0x39d   : > { %v2406_v30 = vadd.f32 %v4222_v39, %v2223_v55  ;;  %v2225_v3 = vpop.f32.mrb[151].mxu0 }
 0x39e   : > { %v2439_v34 = vadd.f32 %v2421_v42, %v4266_v51  ;;  %v2422_v6 = vadd.f32 %v2404_v24, %v2225_v3  ;;  %v2804_v51 = vld [vmem:[%s4369_s2 + $0x2] ss:$0 sm:$0xff] }
 0x3a0   : > { %v2448_v58 = vmax.f32 %v2446_v41, %v2439_v34  ;;  %v2440_v0 = vadd.f32 %v2422_v6, %v4268_v17 }
 0x3a2   : > { %v2456_v27 = vmax.f32 %v2454_v7, %v2440_v0  ;;  %v2229_v60 = vpop.f32.mrb[152].mxu0 }
 0x3a3   : > { %v2230_v11 = vpop.f32.mrb[153].mxu0 }
 0x3a4   : > { %v2423_v40 = vadd.f32 %v2405_v61, %v2230_v11  ;;  %v2232_v59 = vpop.f32.mrb[154].mxu0 }
 0x3a5   : > { %v2233_v5 = vpop.f32.mrb[155].mxu0 }
 0x3a6   : > { %v2441_v35 = vadd.f32 %v2423_v40, %v4270_v57  ;;  %v2424_v4 = vadd.f32 %v2406_v30, %v2233_v5 }
 0x3a8   : > { %v2449_v9 = vmax.f32 %v2447_v50, %v2441_v35  ;;  %v2442_v39 = vadd.f32 %v2424_v4, %v4272_v31  ;;  %v2805_v31 = vld [vmem:[%s4371_s4] ss:$0 sm:$0xff] }
 0x3aa   : > { %v2450_v15 = vmax.f32 %v2449_v9, %v2448_v58  ;;  %v2457_v43 = vmax.f32 %v2455_v52, %v2442_v39  ;;  %v2237_v17 = vpop.f32.mrb[156].mxu0 }
 0x3ab   : > { %v2238_v18 = vpop.f32.mrb[157].mxu0 }
 0x3ac   : > { %v2458_v63 = vmax.f32 %v2457_v43, %v2456_v27  ;;  %v2466_v46 = vadd.f32 %v2804_v51, %v2450_v15  ;;  %v2239_v56 = vpop.f32.mrb[158].mxu0 }
 0x3ad   : > { %v2240_v20 = vpop.f32.mrb[159].mxu0 }
 0x3ae   : > { %v2467_v22 = vadd.f32 %v2804_v51, %v2458_v63  ;;  %v2468_v57 = vmax.f32 %v2466_v46, 0.0 }
 0x3b0   : > { %v2469_v14 = vmax.f32 %v2467_v22, 0.0  ;;  %3147 = vmatprep.mubr.f32.mxu0 %v2468_v57 }
 0x3b2   : > { %3148 = vmatmul.mubr.f32.vlgmr.msra.gmra.mrb[104].mxu0 %v2469_v14 }
 0x485   : > { %v3149_v23 = vpop.f32.mrb[104].mxu0 }
 0x486   : > { %v2571_v13 = vadd.f32 %v3149_v23, %v2805_v31  ;;  %v2552_v16 = vpop.f32.mrb[105].mxu0 }
 0x487   : > { %v2570_v32 = vadd.f32 %v2805_v31, %v2552_v16 }
 0x488   : > { %2573 = vst [vmem:[%s296_s13 + $0x8] sm:$0xff] %v2571_v13 }
 0x489   : > { %2572 = vst [vmem:[%s296_s13] sm:$0xff] %v2570_v32 }
 0x48a   : > { %3567 = shalt.err (!%p3564_p1)
}
 0x48b   : > { %s3568_s14 = scalar_lea.hbm %s4323_s8, 256  ;;  %s3572_s27 = scalar_lea.hbm %s4372_s5, 512 }
 0x48c   : > { %p3569_p3 = scmp.ne.s32.totalorder %s4323_s8, %s3568_s14  ;;  %p3573_p6 = scmp.lt.u32.totalorder %s4323_s8, %s4372_s5 }
 0x48d   : > { %p3574_p11 = scmp.lt.u32.totalorder %s3572_s27, %s3568_s14  ;;  %p3576_p0 = scmp.lt.u32.totalorder %s3568_s14, %s4323_s8 }
 0x48e   : > { %p3570_p2 = pnand %p3569_p3, %p4390_p13 }
 0x48f   : > { %p3575_p12 = por %p3574_p11, %p3573_p6 }
 0x490   : > { %p3571_p5 = pneg %p3570_p2 }
 0x491   : > { %p3577_p7 = por %p3576_p0, %p3575_p12 }
 0x493   : > { %p3578_p8 = pnand %p3577_p7, %p3571_p5 }
 0x495   : > { %3581 = shalt.err (!%p3578_p8)
}
 0x496   : > { %s3642_s12 = smov 128   ;;  %s3643_s15 = smov 8  }
 0x497   : > { %3269 = dma.vmem_to_hbm [thread:$0]  (%p4390_p13), %s4318_s16, 256, %s4323_s8, %s2575_s11, %s3642_s12, %s3642_s12, %s3643_s15  }
 0x498 PF: > { %s2603_s17 = sand.u32 1, %s3612_s18   ;;  %p4391_p9 = scmp.ne.s32.totalorder %s4382_s6, 0 }
 0x499   : > { %s2604_s9 = scalar_lea.sflag [#allocation4], %s2603_s17 }
 0x49a   : > { %p3279_p10 = pnand %p2684_p4, %p4391_p9 }
 0x49c   : > { %3607 = dma.done.wait (!%p3279_p10), %s2604_s9, 256  }
 0x49d   : > { %3609 = vsyncadd (!%p3279_p10), %s2604_s9, 4294967040  ;;  %s4392_s28 = sld [smem:[#allocation15_spill]]  ;;  %p19_p1 = scmp.ge.s32.totalorder %s3699_s24, 4  }
 0x49e   : > { %s4393_s18 = smov %s3616_s19  ;;  %s4394_s19 = smov %s3620_s20 }
 0x49f   : > { %s4396_s21 = smov %s3699_s24  ;;  %21 = sbr.rel (!%p19_p1) target bundleno = 6 (0x6), region = 98 }
 0x4a3   : > { %s4395_s20 = smov %s4392_s28 }
 0x4a6   :  { %2609 = vsyncpa [#allocation3], 1 }
 0x4a7   :  { %2611 = vsyncpa [#allocation3 + $0x1], 1 }
 0x4a8   :  { %2612 = vsyncpa [#allocation6], 1 }
 0x4a9   :  { %2613 = vsyncpa [#allocation4], 1 }
 0x4aa   :  { %2615 = vsyncpa [#allocation4 + $0x1], 1 }

</bundles_post_ra>
